<compile_context>
chip_gen: v7x
topology: tpu7x:2x2x1
jax: 0.10.0
libtpu: 0.0.40
codegen_flags: <defaults>
</compile_context>

<pallas_src>
import functools

import jax
import jax.numpy as jnp
from jax.experimental import pallas as pl
from jax.experimental.pallas import tpu as pltpu

NUM_BOND_TYPE = 6
NUM_BOND_DIRECTION = 3
NUM_ATOM_TYPE = 120
NUM_CHIRALITY_TAG = 3
BN_EPS = 1e-5

# Scoped VMEM limit: 48 MiB is safe on every generation (v7x physical = 64 MiB).
VMEM_LIMIT = 48 * 1024 * 1024


def _round_up(n, m):
    return ((n + m - 1) // m) * m


def _pad2(a, rows, cols):
    return jnp.pad(a, ((0, rows - a.shape[0]), (0, cols - a.shape[1])))


# ---------------------------------------------------------------------------
# Fused kernel: all GIN layers + mean pool + prediction head.
# grid = (num_layer,), "arbitrary" (sequential carry through VMEM scratch).
# ---------------------------------------------------------------------------
def gnn_fused_kernel(h0_ref, a_ref, mask_ref, member_ref, invc_ref, wp_ref, bp_ref,
                     se_ref, w1_ref, b1_ref, w2_ref, vec_ref,
                     o_ref, h_scr, *, n_real):
    l = pl.program_id(0)
    is_last = l == pl.num_programs(0) - 1

    @pl.when(l == 0)
    def _():
        h_scr[...] = h0_ref[...]

    h = h_scr[...]                                                     # [Np, Dp] f32

    # Aggregation: aggr_i = sum_{e: dst(e)=i} h[src(e)] + edge_emb(e)
    #            = (A @ h) + se        (A, h in bf16; f32 accumulation)
    aggr = jnp.dot(a_ref[...], h.astype(jnp.bfloat16),
                   preferred_element_type=jnp.float32) + se_ref[0]     # [Np, Dp]

    # GIN update MLP: Linear(D, 2D) -> ReLU -> Linear(2D, D)
    h1 = jnp.maximum(
        jnp.dot(aggr.astype(jnp.bfloat16), w1_ref[0],
                preferred_element_type=jnp.float32) + b1_ref[0], 0.0)  # [Np, Hp]

    vec = vec_ref[0]                                                   # [3, Dp]
    b2 = vec[0:1, :]
    gamma = vec[1:2, :]
    beta = vec[2:3, :]

    h2 = jnp.dot(h1.astype(jnp.bfloat16), w2_ref[0],
                 preferred_element_type=jnp.float32) + b2              # [Np, Dp]

    # BatchNorm1d (training-mode batch stats, biased variance) over the REAL
    # node rows only (hoisted [Np, 1] mask; padded rows excluded).
    mask = mask_ref[...]                                               # [Np, 1]
    inv_n = 1.0 / float(n_real)
    mean = jnp.sum(h2 * mask, axis=0, keepdims=True) * inv_n           # [1, Dp]
    centered = (h2 - mean) * mask
    var = jnp.sum(centered * centered, axis=0, keepdims=True) * inv_n  # [1, Dp]
    hn = ((h2 - mean) * jax.lax.rsqrt(var + BN_EPS) * gamma + beta) * mask

    # Non-last layers: ReLU (dropout with drop_ratio=0 is identity), carry in
    # VMEM scratch -- single store per layer, no HBM traffic for h.
    @pl.when(jnp.logical_not(is_last))
    def _():
        h_scr[...] = jnp.maximum(hn, 0.0)

    # Last layer (JK='last'): global_mean_pool + linear head, fused here.
    @pl.when(is_last)
    def _():
        pooled = jnp.dot(member_ref[...], hn.astype(jnp.bfloat16),
                         preferred_element_type=jnp.float32) * invc_ref[...]   # [Gp, Dp]
        o_ref[...] = jnp.dot(pooled.astype(jnp.bfloat16), wp_ref[...],
                             preferred_element_type=jnp.float32) + bp_ref[...]  # [Gp, Tp]


# ---------------------------------------------------------------------------
# Parameter init (mirrors the torch module's parameter structure)
# ---------------------------------------------------------------------------
def init_params(key, num_layer, emb_dim, num_tasks):
    def xavier(key, shape):
        fan_out, fan_in = shape[0], shape[1]
        bound = (6.0 / (fan_in + fan_out)) ** 0.5
        return jax.random.uniform(key, shape, jnp.float32, -bound, bound)

    keys = jax.random.split(key, 4 + num_layer * 8 + 2)
    k = iter(keys)
    params = {}
    params["x_emb1"] = xavier(next(k), (NUM_ATOM_TYPE, emb_dim))
    # x_embedding2 exists as a parameter but this spec's GNN.forward only uses
    # x_embedding1(x[:, 0]) (and zeroes its row 0), so it is unused below.
    params["x_emb2"] = xavier(next(k), (NUM_CHIRALITY_TAG, emb_dim))
    layers = []
    for _ in range(num_layer):
        lp = {}
        lp["edge_emb1"] = xavier(next(k), (NUM_BOND_TYPE, emb_dim))
        lp["edge_emb2"] = xavier(next(k), (NUM_BOND_DIRECTION, emb_dim))
        b1 = (1.0 / emb_dim) ** 0.5
        lp["w1"] = jax.random.uniform(next(k), (emb_dim, 2 * emb_dim), jnp.float32, -b1, b1)
        lp["b1"] = jax.random.uniform(next(k), (1, 2 * emb_dim), jnp.float32, -b1, b1)
        b2 = (1.0 / (2 * emb_dim)) ** 0.5
        lp["w2"] = jax.random.uniform(next(k), (2 * emb_dim, emb_dim), jnp.float32, -b2, b2)
        lp["b2"] = jax.random.uniform(next(k), (1, emb_dim), jnp.float32, -b2, b2)
        lp["gamma"] = 1.0 + 0.1 * jax.random.normal(next(k), (1, emb_dim), jnp.float32)
        lp["beta"] = 0.1 * jax.random.normal(next(k), (1, emb_dim), jnp.float32)
        layers.append(lp)
    params["layers"] = layers
    bp = (1.0 / emb_dim) ** 0.5
    params["pred_w"] = jax.random.uniform(next(k), (emb_dim, num_tasks), jnp.float32, -bp, bp)
    params["pred_b"] = jax.random.uniform(next(k), (1, num_tasks), jnp.float32, -bp, bp)
    return params


# ---------------------------------------------------------------------------
# Forward (mirror of GNN_graphpred.forward: gin, JK='last', mean pool, drop=0)
# ---------------------------------------------------------------------------
def gnn_graphpred_forward(params, x, edge_index, edge_attr, batch, num_graphs):
    N = x.shape[0]
    num_layer = len(params["layers"])
    D = params["x_emb1"].shape[1]
    H = 2 * D
    T = params["pred_w"].shape[1]

    Np = _round_up(N, 128)      # lane-dense A / contraction dim
    Dp = _round_up(D, 128)
    Hp = _round_up(H, 128)
    Gp = _round_up(num_graphs, 8)
    Tp = _round_up(T, 128)

    # --- atom embedding: row 0 of x_embedding1 zeroed, x[:, 0] lookup
    #     (exactly as in this spec's GNN.forward). ---
    x_emb1 = params["x_emb1"].at[0].set(0.0)
    h0 = jnp.take(x_emb1, x[:, 0], axis=0)                        # [N, D]
    h0 = _pad2(h0, Np, Dp)                                        # [Np, Dp]

    # --- self loops: edge_index += (i, i), edge_attr += [4, 0] rows ---
    self_loops = jnp.arange(N, dtype=edge_index.dtype)
    src = jnp.concatenate([edge_index[0], self_loops])
    dst = jnp.concatenate([edge_index[1], self_loops])
    self_loop_attr = jnp.concatenate(
        [jnp.full((N, 1), 4, edge_attr.dtype), jnp.zeros((N, 1), edge_attr.dtype)], axis=1)
    ea = jnp.concatenate([edge_attr, self_loop_attr], axis=0)      # [E', 2]

    # Folded adjacency A[i, j] = #edges j -> i (incl. self loop); small ints,
    # exact in bf16.
    A = (jnp.zeros((Np, Np), jnp.float32)
         .at[dst, src].add(1.0)).astype(jnp.bfloat16)              # [Np, Np]

    # Real-row mask, hoisted out of the kernel.
    row_mask = (jnp.arange(Np) < N).astype(jnp.float32)[:, None]   # [Np, 1]

    # Per-layer scattered edge embeddings + stacked/padded weights.
    se_l, w1_l, b1_l, w2_l, vec_l = [], [], [], [], []
    for lp in params["layers"]:
        ee = (jnp.take(lp["edge_emb1"], ea[:, 0], axis=0)
              + jnp.take(lp["edge_emb2"], ea[:, 1], axis=0))       # [E', D]
        se = jnp.zeros((Np, D), jnp.float32).at[dst].add(ee)       # scatter-add at dst
        se_l.append(_pad2(se, Np, Dp))
        w1_l.append(_pad2(lp["w1"], Dp, Hp).astype(jnp.bfloat16))
        b1_l.append(_pad2(lp["b1"], 1, Hp))
        w2_l.append(_pad2(lp["w2"], Hp, Dp).astype(jnp.bfloat16))
        # Pack the small Dp-wide per-layer vectors into one block: [b2; gamma; beta]
        vec_l.append(jnp.concatenate(
            [_pad2(lp["b2"], 1, Dp), _pad2(lp["gamma"], 1, Dp), _pad2(lp["beta"], 1, Dp)],
            axis=0))                                               # [3, Dp]

    se_all = jnp.stack(se_l)        # [L, Np, Dp] f32
    w1_all = jnp.stack(w1_l)        # [L, Dp, Hp] bf16
    b1_all = jnp.stack(b1_l)        # [L, 1, Hp]  f32
    w2_all = jnp.stack(w2_l)        # [L, Hp, Dp] bf16
    vec_all = jnp.stack(vec_l)      # [L, 3, Dp]  f32 (b2, gamma, beta)

    # Mean-pool membership matrix + per-graph 1/count (normalized in-kernel).
    member = (jnp.zeros((Gp, Np), jnp.float32)
              .at[batch, jnp.arange(N)].set(1.0))                  # [Gp, Np] 0/1
    counts = member.sum(axis=1, keepdims=True)                     # [Gp, 1]
    inv_counts = jnp.where(counts > 0, 1.0 / jnp.maximum(counts, 1.0), 0.0)
    member = member.astype(jnp.bfloat16)

    wp = _pad2(params["pred_w"], Dp, Tp).astype(jnp.bfloat16)      # [Dp, Tp]
    bp = _pad2(params["pred_b"], 1, Tp)                            # [1, Tp]

    kern = functools.partial(gnn_fused_kernel, n_real=N)
    const = lambda l: (0, 0)
    per_layer = lambda l: (l, 0, 0)

    out_p = pl.pallas_call(
        kern,
        out_shape=jax.ShapeDtypeStruct((Gp, Tp), jnp.float32),
        grid_spec=pltpu.PrefetchScalarGridSpec(
            num_scalar_prefetch=0,
            grid=(num_layer,),
            in_specs=[
                pl.BlockSpec((Np, Dp), const),          # h0           (resident)
                pl.BlockSpec((Np, Np), const),          # A            (resident)
                pl.BlockSpec((Np, 1), const),           # row mask     (resident)
                pl.BlockSpec((Gp, Np), const),          # membership   (resident)
                pl.BlockSpec((Gp, 1), const),           # 1/counts     (resident)
                pl.BlockSpec((Dp, Tp), const),          # pred weight  (resident)
                pl.BlockSpec((1, Tp), const),           # pred bias    (resident)
                pl.BlockSpec((1, Np, Dp), per_layer),   # se  per layer
                pl.BlockSpec((1, Dp, Hp), per_layer),   # w1
                pl.BlockSpec((1, 1, Hp), per_layer),    # b1
                pl.BlockSpec((1, Hp, Dp), per_layer),   # w2
                pl.BlockSpec((1, 3, Dp), per_layer),    # [b2; gamma; beta]
            ],
            out_specs=pl.BlockSpec((Gp, Tp), const),    # graph predictions
            scratch_shapes=[pltpu.VMEM((Np, Dp), jnp.float32)],   # carried node state h
        ),
        compiler_params=pltpu.CompilerParams(
            dimension_semantics=("arbitrary",),
            vmem_limit_bytes=VMEM_LIMIT),
    )(h0, A, row_mask, member, inv_counts, wp, bp,
      se_all, w1_all, b1_all, w2_all, vec_all)

    return out_p[:num_graphs, :T]                                  # [G, num_tasks]


# ---------------------------------------------------------------------------
if __name__ == "__main__":
    key = jax.random.PRNGKey(0)
    kp, kx, ke, ka = jax.random.split(key, 4)

    num_layer = 3
    emb_dim = 32
    num_tasks = 4
    num_nodes = 12
    num_graphs = 2

    params = init_params(kp, num_layer, emb_dim, num_tasks)

    # node features: [N, 2] ints (atom type, chirality tag)
    x = jnp.stack(
        [jax.random.randint(kx, (num_nodes,), 0, NUM_ATOM_TYPE),
         jax.random.randint(jax.random.fold_in(kx, 1), (num_nodes,), 0, NUM_CHIRALITY_TAG)],
        axis=1).astype(jnp.int32)

    # a small two-graph edge set (directed edges, both directions listed)
    src = jnp.array([0, 1, 1, 2, 2, 3, 3, 4, 4, 5, 7, 8, 8, 9, 10, 11], dtype=jnp.int32)
    dst = jnp.array([1, 0, 2, 1, 3, 2, 4, 3, 5, 4, 8, 7, 9, 8, 11, 10], dtype=jnp.int32)
    edge_index = jnp.stack([src, dst], axis=0)                              # [2, 16]
    edge_attr = jnp.stack(
        [jax.random.randint(ke, (src.shape[0],), 0, NUM_BOND_TYPE),
         jax.random.randint(ka, (src.shape[0],), 0, NUM_BOND_DIRECTION)],
        axis=1).astype(jnp.int32)                                           # [16, 2]

    batch = jnp.array([0, 0, 0, 0, 0, 0, 0, 1, 1, 1, 1, 1], dtype=jnp.int32)  # [N]

    out = gnn_graphpred_forward(params, x, edge_index, edge_attr, batch, num_graphs)
    out = jax.block_until_ready(out)
    assert out.shape == (num_graphs, num_tasks)
    assert bool(jnp.all(jnp.isfinite(out)))
    print("KERNEL_OK")
</pallas_src>

<mosaic_0001>
module attributes {stable_mosaic.version = 11 : i64} {
  func.func @gnn_fused_kernel(%arg0: i32, %arg1: memref<128x128xf32, #tpu.memory_space<vmem>>, %arg2: memref<128x128xbf16, #tpu.memory_space<vmem>>, %arg3: memref<128x1xf32, #tpu.memory_space<vmem>>, %arg4: memref<8x128xbf16, #tpu.memory_space<vmem>>, %arg5: memref<8x1xf32, #tpu.memory_space<vmem>>, %arg6: memref<128x128xbf16, #tpu.memory_space<vmem>>, %arg7: memref<1x128xf32, #tpu.memory_space<vmem>>, %arg8: memref<1x128x128xf32, #tpu.memory_space<vmem>>, %arg9: memref<1x128x128xbf16, #tpu.memory_space<vmem>>, %arg10: memref<1x1x128xf32, #tpu.memory_space<vmem>>, %arg11: memref<1x128x128xbf16, #tpu.memory_space<vmem>>, %arg12: memref<1x3x128xf32, #tpu.memory_space<vmem>>, %arg13: memref<8x128xf32, #tpu.memory_space<vmem>>, %arg14: memref<128x128xf32, #tpu.memory_space<vmem>>) attributes {dimension_semantics = [#tpu.dimension_semantics<arbitrary>], iteration_bounds = array<i64: 3>, scalar_prefetch = 0 : i64, scratch_operands = 1 : i64, tpu.core_type = #tpu.core_type<tc>, window_params = [{pipeline_mode = #tpu.pipeline_mode<synchronous>, transform_indices = @transform_0, window_bounds = array<i64: 128, 128>}, {pipeline_mode = #tpu.pipeline_mode<synchronous>, transform_indices = @transform_1, window_bounds = array<i64: 128, 128>}, {pipeline_mode = #tpu.pipeline_mode<synchronous>, transform_indices = @transform_2, window_bounds = array<i64: 128, 1>}, {pipeline_mode = #tpu.pipeline_mode<synchronous>, transform_indices = @transform_3, window_bounds = array<i64: 8, 128>}, {pipeline_mode = #tpu.pipeline_mode<synchronous>, transform_indices = @transform_4, window_bounds = array<i64: 8, 1>}, {pipeline_mode = #tpu.pipeline_mode<synchronous>, transform_indices = @transform_5, window_bounds = array<i64: 128, 128>}, {pipeline_mode = #tpu.pipeline_mode<synchronous>, transform_indices = @transform_6, window_bounds = array<i64: 1, 128>}, {transform_indices = @transform_7, window_bounds = array<i64: 1, 128, 128>}, {transform_indices = @transform_8, window_bounds = array<i64: 1, 128, 128>}, {transform_indices = @transform_9, window_bounds = array<i64: 1, 1, 128>}, {transform_indices = @transform_10, window_bounds = array<i64: 1, 128, 128>}, {transform_indices = @transform_11, window_bounds = array<i64: 1, 3, 128>}, {pipeline_mode = #tpu.pipeline_mode<synchronous>, transform_indices = @transform_12, window_bounds = array<i64: 8, 128>}]} {
    %c2_i32 = arith.constant 2 : i32
    %0 = arith.cmpi eq, %arg0, %c2_i32 : i32
    %c0_i32 = arith.constant 0 : i32
    %1 = arith.cmpi eq, %arg0, %c0_i32 : i32
    %2 = arith.extui %1 : i1 to i32
    %c0_i32_0 = arith.constant 0 : i32
    %3 = arith.cmpi ne, %2, %c0_i32_0 : i32
    scf.if %3 {
      %c0_31 = arith.constant 0 : index
      %c0_32 = arith.constant 0 : index
      %66 = vector.load %arg1[%c0_31, %c0_32] : memref<128x128xf32, #tpu.memory_space<vmem>>, vector<128x128xf32>
      %c0_33 = arith.constant 0 : index
      %c0_34 = arith.constant 0 : index
      %67 = vector.load %arg14[%c0_33, %c0_34] : memref<128x128xf32, #tpu.memory_space<vmem>>, vector<128x128xf32>
      tpu.vector_store %arg14[%c0_33, %c0_34], %66 {strides = array<i32>} : memref<128x128xf32, #tpu.memory_space<vmem>>, vector<128x128xf32>,
    } else {
    }
    %c0 = arith.constant 0 : index
    %c0_1 = arith.constant 0 : index
    %4 = vector.load %arg14[%c0, %c0_1] : memref<128x128xf32, #tpu.memory_space<vmem>>, vector<128x128xf32>
    %c0_2 = arith.constant 0 : index
    %c0_3 = arith.constant 0 : index
    %5 = vector.load %arg2[%c0_2, %c0_3] : memref<128x128xbf16, #tpu.memory_space<vmem>>, vector<128x128xbf16>
    %6 = arith.truncf %4 : vector<128x128xf32> to vector<128x128xbf16>
    %cst = arith.constant dense<0.000000e+00> : vector<128x128xf32>
    %7 = tpu.matmul %5, %6, %cst {dimension_numbers = #tpu.dot_dimension_numbers<[1], [0], [0], [1], [0, 0, 1, 1], [], []>} : vector<128x128xbf16>, vector<128x128xbf16>, vector<128x128xf32> -> vector<128x128xf32>
    %c0_4 = arith.constant 0 : index
    %c0_5 = arith.constant 0 : index
    %c0_6 = arith.constant 0 : index
    %8 = vector.load %arg8[%c0_4, %c0_5, %c0_6] : memref<1x128x128xf32, #tpu.memory_space<vmem>>, vector<1x128x128xf32>
    %9 = vector.shape_cast %8 : vector<1x128x128xf32> to vector<128x128xf32>
    %10 = arith.addf %7, %9 : vector<128x128xf32>
    %11 = arith.truncf %10 : vector<128x128xf32> to vector<128x128xbf16>
    %c0_7 = arith.constant 0 : index
    %c0_8 = arith.constant 0 : index
    %c0_9 = arith.constant 0 : index
    %12 = vector.load %arg9[%c0_7, %c0_8, %c0_9] : memref<1x128x128xbf16, #tpu.memory_space<vmem>>, vector<1x128x128xbf16>
    %13 = vector.shape_cast %12 : vector<1x128x128xbf16> to vector<128x128xbf16>
    %cst_10 = arith.constant dense<0.000000e+00> : vector<128x128xf32>
    %14 = tpu.matmul %11, %13, %cst_10 {dimension_numbers = #tpu.dot_dimension_numbers<[1], [0], [0], [1], [0, 0, 1, 1], [], []>} : vector<128x128xbf16>, vector<128x128xbf16>, vector<128x128xf32> -> vector<128x128xf32>
    %c0_11 = arith.constant 0 : index
    %c0_12 = arith.constant 0 : index
    %c0_13 = arith.constant 0 : index
    %15 = vector.load %arg10[%c0_11, %c0_12, %c0_13] : memref<1x1x128xf32, #tpu.memory_space<vmem>>, vector<1x1x128xf32>
    %16 = vector.shape_cast %15 : vector<1x1x128xf32> to vector<1x128xf32>
    %17 = vector.broadcast %16 : vector<1x128xf32> to vector<128x128xf32>
    %18 = arith.addf %14, %17 : vector<128x128xf32>
    %cst_14 = arith.constant 0.000000e+00 : f32
    %19 = vector.broadcast %cst_14 : f32 to vector<128x128xf32>
    %20 = arith.maximumf %18, %19 : vector<128x128xf32>
    %c0_15 = arith.constant 0 : index
    %c0_16 = arith.constant 0 : index
    %c0_17 = arith.constant 0 : index
    %21 = vector.load %arg12[%c0_15, %c0_16, %c0_17] : memref<1x3x128xf32, #tpu.memory_space<vmem>>, vector<1x3x128xf32>
    %22 = vector.shape_cast %21 : vector<1x3x128xf32> to vector<3x128xf32>
    %23 = vector.extract_strided_slice %22 {offsets = [0, 0], sizes = [1, 128], strides = [1, 1]} : vector<3x128xf32> to vector<1x128xf32>
    %24 = vector.extract_strided_slice %22 {offsets = [1, 0], sizes = [1, 128], strides = [1, 1]} : vector<3x128xf32> to vector<1x128xf32>
    %25 = vector.extract_strided_slice %22 {offsets = [2, 0], sizes = [1, 128], strides = [1, 1]} : vector<3x128xf32> to vector<1x128xf32>
    %26 = arith.truncf %20 : vector<128x128xf32> to vector<128x128xbf16>
    %c0_18 = arith.constant 0 : index
    %c0_19 = arith.constant 0 : index
    %c0_20 = arith.constant 0 : index
    %27 = vector.load %arg11[%c0_18, %c0_19, %c0_20] : memref<1x128x128xbf16, #tpu.memory_space<vmem>>, vector<1x128x128xbf16>
    %28 = vector.shape_cast %27 : vector<1x128x128xbf16> to vector<128x128xbf16>
    %cst_21 = arith.constant dense<0.000000e+00> : vector<128x128xf32>
    %29 = tpu.matmul %26, %28, %cst_21 {dimension_numbers = #tpu.dot_dimension_numbers<[1], [0], [0], [1], [0, 0, 1, 1], [], []>} : vector<128x128xbf16>, vector<128x128xbf16>, vector<128x128xf32> -> vector<128x128xf32>
    %30 = vector.broadcast %23 : vector<1x128xf32> to vector<128x128xf32>
    %31 = arith.addf %29, %30 : vector<128x128xf32>
    %c0_22 = arith.constant 0 : index
    %c0_23 = arith.constant 0 : index
    %32 = vector.load %arg3[%c0_22, %c0_23] : memref<128x1xf32, #tpu.memory_space<vmem>>, vector<128x1xf32>
    %33 = vector.broadcast %32 : vector<128x1xf32> to vector<128x128xf32>
    %34 = arith.mulf %31, %33 : vector<128x128xf32>
    %cst_24 = arith.constant dense<0.000000e+00> : vector<128xf32>
    %35 = vector.multi_reduction <add>, %34, %cst_24 [0] : vector<128x128xf32> to vector<128xf32>
    %36 = vector.shape_cast %35 : vector<128xf32> to vector<1x128xf32>
    %cst_25 = arith.constant 0.0833333358 : f32
    %37 = vector.broadcast %cst_25 : f32 to vector<1x128xf32>
    %38 = arith.mulf %36, %37 : vector<1x128xf32>
    %39 = vector.broadcast %38 : vector<1x128xf32> to vector<128x128xf32>
    %40 = arith.subf %31, %39 : vector<128x128xf32>
    %41 = vector.broadcast %32 : vector<128x1xf32> to vector<128x128xf32>
    %42 = arith.mulf %40, %41 : vector<128x128xf32>
    %43 = arith.mulf %42, %42 : vector<128x128xf32>
    %cst_26 = arith.constant dense<0.000000e+00> : vector<128xf32>
    %44 = vector.multi_reduction <add>, %43, %cst_26 [0] : vector<128x128xf32> to vector<128xf32>
    %45 = vector.shape_cast %44 : vector<128xf32> to vector<1x128xf32>
    %cst_27 = arith.constant 0.0833333358 : f32
    %46 = vector.broadcast %cst_27 : f32 to vector<1x128xf32>
    %47 = arith.mulf %45, %46 : vector<1x128xf32>
    %48 = vector.broadcast %38 : vector<1x128xf32> to vector<128x128xf32>
    %49 = arith.subf %31, %48 : vector<128x128xf32>
    %cst_28 = arith.constant 9.99999974E-6 : f32
    %50 = vector.broadcast %cst_28 : f32 to vector<1x128xf32>
    %51 = arith.addf %47, %50 : vector<1x128xf32>
    %52 = math.rsqrt %51 : vector<1x128xf32>
    %53 = vector.broadcast %52 : vector<1x128xf32> to vector<128x128xf32>
    %54 = arith.mulf %49, %53 : vector<128x128xf32>
    %55 = vector.broadcast %24 : vector<1x128xf32> to vector<128x128xf32>
    %56 = arith.mulf %54, %55 : vector<128x128xf32>
    %57 = vector.broadcast %25 : vector<1x128xf32> to vector<128x128xf32>
    %58 = arith.addf %56, %57 : vector<128x128xf32>
    %59 = vector.broadcast %32 : vector<128x1xf32> to vector<128x128xf32>
    %60 = arith.mulf %58, %59 : vector<128x128xf32>
    %true = arith.constant true
    %61 = arith.xori %0, %true : i1
    %62 = arith.extui %61 : i1 to i32
    %c0_i32_29 = arith.constant 0 : i32
    %63 = arith.cmpi ne, %62, %c0_i32_29 : i32
    scf.if %63 {
      %cst_31 = arith.constant 0.000000e+00 : f32
      %66 = vector.broadcast %cst_31 : f32 to vector<128x128xf32>
      %67 = arith.maximumf %60, %66 : vector<128x128xf32>
      %c0_32 = arith.constant 0 : index
      %c0_33 = arith.constant 0 : index
      %68 = vector.load %arg14[%c0_32, %c0_33] : memref<128x128xf32, #tpu.memory_space<vmem>>, vector<128x128xf32>
      tpu.vector_store %arg14[%c0_32, %c0_33], %67 {strides = array<i32>} : memref<128x128xf32, #tpu.memory_space<vmem>>, vector<128x128xf32>,
    } else {
    }
    %64 = arith.extui %0 : i1 to i32
    %c0_i32_30 = arith.constant 0 : i32
    %65 = arith.cmpi ne, %64, %c0_i32_30 : i32
    scf.if %65 {
      %c0_31 = arith.constant 0 : index
      %c0_32 = arith.constant 0 : index
      %66 = vector.load %arg4[%c0_31, %c0_32] : memref<8x128xbf16, #tpu.memory_space<vmem>>, vector<8x128xbf16>
      %67 = arith.truncf %60 : vector<128x128xf32> to vector<128x128xbf16>
      %cst_33 = arith.constant dense<0.000000e+00> : vector<8x128xf32>
      %68 = tpu.matmul %66, %67, %cst_33 {dimension_numbers = #tpu.dot_dimension_numbers<[1], [0], [0], [1], [0, 0, 1, 1], [], []>} : vector<8x128xbf16>, vector<128x128xbf16>, vector<8x128xf32> -> vector<8x128xf32>
      %c0_34 = arith.constant 0 : index
      %c0_35 = arith.constant 0 : index
      %69 = vector.load %arg5[%c0_34, %c0_35] : memref<8x1xf32, #tpu.memory_space<vmem>>, vector<8x1xf32>
      %70 = vector.broadcast %69 : vector<8x1xf32> to vector<8x128xf32>
      %71 = arith.mulf %68, %70 : vector<8x128xf32>
      %72 = arith.truncf %71 : vector<8x128xf32> to vector<8x128xbf16>
      %c0_36 = arith.constant 0 : index
      %c0_37 = arith.constant 0 : index
      %73 = vector.load %arg6[%c0_36, %c0_37] : memref<128x128xbf16, #tpu.memory_space<vmem>>, vector<128x128xbf16>
      %cst_38 = arith.constant dense<0.000000e+00> : vector<8x128xf32>
      %74 = tpu.matmul %72, %73, %cst_38 {dimension_numbers = #tpu.dot_dimension_numbers<[1], [0], [0], [1], [0, 0, 1, 1], [], []>} : vector<8x128xbf16>, vector<128x128xbf16>, vector<8x128xf32> -> vector<8x128xf32>
      %c0_39 = arith.constant 0 : index
      %c0_40 = arith.constant 0 : index
      %75 = vector.load %arg7[%c0_39, %c0_40] : memref<1x128xf32, #tpu.memory_space<vmem>>, vector<1x128xf32>
      %76 = vector.broadcast %75 : vector<1x128xf32> to vector<8x128xf32>
      %77 = arith.addf %74, %76 : vector<8x128xf32>
      %c0_41 = arith.constant 0 : index
      %c0_42 = arith.constant 0 : index
      %78 = vector.load %arg13[%c0_41, %c0_42] : memref<8x128xf32, #tpu.memory_space<vmem>>, vector<8x128xf32>
      tpu.vector_store %arg13[%c0_41, %c0_42], %77 {strides = array<i32>} : memref<8x128xf32, #tpu.memory_space<vmem>>, vector<8x128xf32>,
    } else {
    }
    return
  }
  func.func @transform_0(%arg0: i32) -> (i32, i32) {
    %c0_i32 = arith.constant 0 : i32
    %c0_i32_0 = arith.constant 0 : i32
    %c0_i32_1 = arith.constant 0 : i32
    return %c0_i32, %c0_i32_0 : i32, i32
  }
  func.func @transform_1(%arg0: i32) -> (i32, i32) {
    %c0_i32 = arith.constant 0 : i32
    %c0_i32_0 = arith.constant 0 : i32
    %c0_i32_1 = arith.constant 0 : i32
    return %c0_i32, %c0_i32_0 : i32, i32
  }
  func.func @transform_2(%arg0: i32) -> (i32, i32) {
    %c0_i32 = arith.constant 0 : i32
    %c0_i32_0 = arith.constant 0 : i32
    %c0_i32_1 = arith.constant 0 : i32
    return %c0_i32, %c0_i32_0 : i32, i32
  }
  func.func @transform_3(%arg0: i32) -> (i32, i32) {
    %c0_i32 = arith.constant 0 : i32
    %c0_i32_0 = arith.constant 0 : i32
    %c0_i32_1 = arith.constant 0 : i32
    return %c0_i32, %c0_i32_0 : i32, i32
  }
  func.func @transform_4(%arg0: i32) -> (i32, i32) {
    %c0_i32 = arith.constant 0 : i32
    %c0_i32_0 = arith.constant 0 : i32
    %c0_i32_1 = arith.constant 0 : i32
    return %c0_i32, %c0_i32_0 : i32, i32
  }
  func.func @transform_5(%arg0: i32) -> (i32, i32) {
    %c0_i32 = arith.constant 0 : i32
    %c0_i32_0 = arith.constant 0 : i32
    %c0_i32_1 = arith.constant 0 : i32
    return %c0_i32, %c0_i32_0 : i32, i32
  }
  func.func @transform_6(%arg0: i32) -> (i32, i32) {
    %c0_i32 = arith.constant 0 : i32
    %c0_i32_0 = arith.constant 0 : i32
    %c0_i32_1 = arith.constant 0 : i32
    return %c0_i32, %c0_i32_0 : i32, i32
  }
  func.func @transform_7(%arg0: i32) -> (i32, i32, i32) {
    %c0_i32 = arith.constant 0 : i32
    %c0_i32_0 = arith.constant 0 : i32
    %c0_i32_1 = arith.constant 0 : i32
    return %arg0, %c0_i32, %c0_i32_0 : i32, i32, i32
  }
  func.func @transform_8(%arg0: i32) -> (i32, i32, i32) {
    %c0_i32 = arith.constant 0 : i32
    %c0_i32_0 = arith.constant 0 : i32
    %c0_i32_1 = arith.constant 0 : i32
    return %arg0, %c0_i32, %c0_i32_0 : i32, i32, i32
  }
  func.func @transform_9(%arg0: i32) -> (i32, i32, i32) {
    %c0_i32 = arith.constant 0 : i32
    %c0_i32_0 = arith.constant 0 : i32
    %c0_i32_1 = arith.constant 0 : i32
    return %arg0, %c0_i32, %c0_i32_0 : i32, i32, i32
  }
  func.func @transform_10(%arg0: i32) -> (i32, i32, i32) {
    %c0_i32 = arith.constant 0 : i32
    %c0_i32_0 = arith.constant 0 : i32
    %c0_i32_1 = arith.constant 0 : i32
    return %arg0, %c0_i32, %c0_i32_0 : i32, i32, i32
  }
  func.func @transform_11(%arg0: i32) -> (i32, i32, i32) {
    %c0_i32 = arith.constant 0 : i32
    %c0_i32_0 = arith.constant 0 : i32
    %c0_i32_1 = arith.constant 0 : i32
    return %arg0, %c0_i32, %c0_i32_0 : i32, i32, i32
  }
  func.func @transform_12(%arg0: i32) -> (i32, i32) {
    %c0_i32 = arith.constant 0 : i32
    %c0_i32_0 = arith.constant 0 : i32
    %c0_i32_1 = arith.constant 0 : i32
    return %c0_i32, %c0_i32_0 : i32, i32
  }
}

</mosaic_0001>

<bundles_post_ra>
// kernel: tpu_custom_call.1
= control target key start
LH: loop header
LB: loop body
LE: loop exit
PB: predicated region body
PF: predicated region fallthrough
CT: control target
= control target key end

     0   :  { %s3203_s0 = inlined_call_operand.vmem [shape: f32[128,128], index: 0, kind: input, shape index: {}]   ;;  %s3204_s1 = inlined_call_operand.hbm [shape: bf16[128,128], index: 1, kind: input, shape index: {}]   ;;  %s3205_s2 = inlined_call_operand.vmem [shape: f32[128,1], index: 2, kind: input, shape index: {}]   ;;  %s3206_s3 = inlined_call_operand.vmem [shape: bf16[8,128], index: 3, kind: input, shape index: {}]   ;;  %s3207_s4 = inlined_call_operand.vmem [shape: f32[8,1], index: 4, kind: input, shape index: {}]   ;;  %s3208_s5 = inlined_call_operand.hbm [shape: bf16[128,128], index: 5, kind: input, shape index: {}]   ;;  %s3209_s6 = inlined_call_operand.vmem [shape: f32[1,128], index: 6, kind: input, shape index: {}]   ;;  %s3210_s7 = inlined_call_operand.hbm [shape: f32[3,128,128], index: 7, kind: input, shape index: {}]   ;;  %s3211_s8 = inlined_call_operand.hbm [shape: bf16[3,128,128], index: 8, kind: input, shape index: {}]   ;;  %s3212_s9 = inlined_call_operand.vmem [shape: f32[3,1,128], index: 9, kind: input, shape index: {}]   ;;  %s3213_s10 = inlined_call_operand.hbm [shape: bf16[3,128,128], index: 10, kind: input, shape index: {}]   ;;  %s3214_s11 = inlined_call_operand.vmem [shape: f32[3,3,128], index: 11, kind: input, shape index: {}]   ;;  %s3215_s12 = inlined_call_operand.hbm [shape: f32[8,128], index: 12, kind: output, shape index: {}]  }
   0x1   :  { %3233 = sst [smem:[#allocation18_spill]] %s3205_s2 }
   0x2   :  { %3234 = sst [smem:[#allocation19_spill]] %s3206_s3 }
   0x3   :  { %3235 = sst [smem:[#allocation20_spill]] %s3207_s4 }
   0x4   :  { %3236 = sst [smem:[#allocation21_spill]] %s3209_s6 }
   0x5   :  { %3237 = sst [smem:[#allocation22_spill]] %s3215_s12 }
   0x6   :  { %17 = vsyncpa [#allocation4], 0 }
   0x7   :  { %18 = vsyncpa [#allocation7], 0 }
   0x8   :  { %19 = vsyncpa [#allocation5], 0  ;;  %s2484_s21 = smov 0   ;;  %s2486_s22 = smov 0  }
   0x9   :  { %s2488_s23 = smov 0   ;;  %s2490_s24 = smov 0  }
   0xa LB: > { %s2503_s25 = sadd.s32 4294967295, %s2403_s24   ;;  %s2506_s26 = sadd.s32 1, %s2403_s24   ;;  %s2403_s24 = sphi %s2490_s24, %s3268_s24   ;;  %s2399_s23 = sphi %s2488_s23, %s3272_s23   ;;  %s2395_s22 = sphi %s2486_s22, %s3271_s22   ;;  %s2391_s21 = sphi %s2484_s21, %s3270_s21  }
   0xb   : > { %3238 = sst [smem:[#allocation16_spill]] %s2506_s26  ;;  %s176_s27 = ssub.s32 %s2403_s24, %s2506_s26 }
   0xc   : > { %s179_s28 = sadd.s32 1, %s2399_s23  ;;  %p177_p0 = scmp.eq.s32.totalorder %s176_s27, 0 }
   0xd   : > { %p186_p1 = scmp.ne.s32.totalorder %s2399_s23, %s2395_s22  ;;  %p187_p2 = scmp.eq.s32.totalorder %s2403_s24, 0 }
   0xe   : > { %p192_p3 = scmp.ne.s32.totalorder %s2395_s22, %s2391_s21  ;;  %p3218_p5 = scmp.eq.s32.totalorder %s2503_s25, 0 }
   0xf   : > { %s2516_s29 = scalar_select %p177_p0, %s2399_s23, %s179_s28  }
  0x10   : > { %p2518_p4 = por %p187_p2, %p186_p1  ;;  %p1781_p6 = scmp.ge.s32.totalorder %s2403_s24, 1 }
  0x11   : > { %3239 = sst [smem:[#allocation17_spill]] %s2516_s29  ;;  %p328_p7 = scmp.lt.s32.totalorder %s2403_s24, 4 }
  0x12   : > { %p2527_p8 = por %p3218_p5, %p192_p3  ;;  %s2405_s15 = smov [#allocation3]  }
  0x13   : > { %p2532_p10 = pnand %p1781_p6, %p328_p7  ;;  %s343_s16 = sshll.u32 %s2405_s15, 4  ;;  %s344_s16 = int_to_ptr.vmem [resolvable:$true] %s343_s16 }
  0x14   : > { %s3241_s13 = scalar_select %p2527_p8, 1, 0 }
  0x15   : > { %s3242_s14 = scalar_select %p2532_p10, 1, 0 }
  0x16   : > { %p2081_p11 = pneg %p2532_p10  ;;  %p2100_p13 = scmp.lt.s32.totalorder %s2403_s24, 3 }
  0x17   : > { %s382_s18 = sand.u32 1, %s2403_s24   ;;  %s2185_s28 = scalar_lea.hbm %s3204_s1, 1024 }
  0x18   : > { %p2540_p12 = pnand %p2081_p11, %p3218_p5  ;;  %p2549_p0 = pnand %p2100_p13, %p2518_p4 }
  0x19   : > { %p2186_p1 = scmp.ne.s32.totalorder %s3204_s1, %s2185_s28  ;;  %p2192_p4 = scmp.lt.u32.totalorder %s2185_s28, %s3204_s1 }
  0x1a   : > { %s3243_s17 = scalar_select %p2540_p12, 1, 0 }
  0x1b   : > { %s3244_s20 = scalar_select %p2549_p0, 1, 0 }
  0x1c   : > { %p3224_p2 = pneg %p2540_p12 }
  0x1e   : > { %p2188_p3 = pnand %p3224_p2, %p2186_p1 }
  0x20   : > { %p2189_p6 = pneg %p2188_p3 }
  0x22   : > { %p2194_p7 = pnand %p2192_p4, %p2189_p6 }
  0x24   : > { %2197 = shalt.err (!%p2194_p7)
}
  0x25   : > { %s2198_s26 = scalar_lea.vmem %s344_s16, 1024  ;;  %p2206_p5 = scmp.lt.s32.totalorder %s344_s16, %s344_s16 }
  0x26   : > { %p2199_p11 = scmp.ne.s32.totalorder %s344_s16, %s2198_s26  ;;  %p2207_p8 = scmp.lt.s32.totalorder %s2198_s26, %s2198_s26 }
  0x28   : > { %p2201_p13 = pnand %p2199_p11, %p3224_p2  ;;  %p2208_p10 = por %p2207_p8, %p2206_p5 }
  0x2a   : > { %p2202_p9 = pneg %p2201_p13 }
  0x2c   : > { %p2209_p0 = pnand %p2208_p10, %p2202_p9 }
  0x2e   : > { %2212 = shalt.err (!%p2209_p0)
}
  0x2f   : > { %s3227_s29 = smov 64   ;;  %s2407_s19 = smov 4  }
  0x30   : > { %2084 = dma.hbm_to_vmem [thread:$0]  (!%p2540_p12), %s3204_s1, 1024, %s344_s16, [#allocation4], %s3227_s29, %s3227_s29, %s2407_s19  }
  0x31   : > { %s3245_s28 = sand.u32 1, %s2399_s23   ;;  %s1842_s26 = sshll.u32 %s2403_s24, 11 }
  0x32   : > { %s1785_s15 = sshll.u32 %s3245_s28, 7  ;;  %s2584_s6 = scalar_lea.hbm %s3210_s7, %s1842_s26 }
  0x33   : > { %s386_s3 = scalar_lea.vmem [#allocation8], %s1785_s15  ;;  %s2588_s2 = scalar_lea.sflag [#allocation4], %s382_s18 }
  0x34   : > { %s393_s4 = sshll.u32 %s386_s3, 4  ;;  %s2213_s21 = scalar_lea.hbm %s2584_s6, 2048  ;;  %s2586_s4 = int_to_ptr.vmem [resolvable:$true] %s393_s4 }
  0x35   : > { %p2214_p5 = scmp.ne.s32.totalorder %s2584_s6, %s2213_s21  ;;  %p3246_p8 = scmp.ne.s32.totalorder %s3244_s20, 0 }
  0x36   : > { %s2218_s28 = scalar_lea.hbm %s3210_s7, 6144  ;;  %p2219_p1 = scmp.lt.u32.totalorder %s2584_s6, %s3210_s7 }
  0x37   : > { %p2594_p9 = pneg %p3246_p8  ;;  %p2220_p3 = scmp.lt.u32.totalorder %s2218_s28, %s2213_s21 }
  0x38   : > { %p2222_p4 = scmp.lt.u32.totalorder %s2213_s21, %s2584_s6 }
  0x39   : > { %s3247_s16 = scalar_select %p2594_p9, 1, 0 }
  0x3a   : > { %p2216_p10 = pnand %p2594_p9, %p2214_p5  ;;  %p2221_p6 = por %p2220_p3, %p2219_p1 }
  0x3c   : > { %p2217_p0 = pneg %p2216_p10  ;;  %p2223_p7 = por %p2222_p4, %p2221_p6 }
  0x3e   : > { %p2224_p11 = pnand %p2223_p7, %p2217_p0 }
  0x40   : > { %2227 = shalt.err (!%p2224_p11)
}
  0x41   : > { %s2228_s18 = scalar_lea.vmem %s2586_s4, 2048  ;;  %s2408_s26 = smov [#allocation8]  }
  0x42   : > { %p2229_p13 = scmp.ne.s32.totalorder %s2586_s4, %s2228_s18  ;;  %s2233_s30 = sshll.u32 %s2408_s26, 4  ;;  %s2234_s30 = int_to_ptr.vmem [resolvable:$false] %s2233_s30 }
  0x43   : > { %s2235_s12 = scalar_lea.vmem %s2234_s30, 4096  ;;  %p2236_p2 = scmp.lt.s32.totalorder %s2586_s4, %s2234_s30 }
  0x44   : > { %p2231_p5 = pnand %p2229_p13, %p2594_p9  ;;  %p2237_p12 = scmp.lt.s32.totalorder %s2235_s12, %s2228_s18 }
  0x46   : > { %p2232_p10 = pneg %p2231_p5  ;;  %p2238_p1 = por %p2237_p12, %p2236_p2 }
  0x48   : > { %p2239_p3 = pnand %p2238_p1, %p2232_p10 }
  0x4a   : > { %2242 = shalt.err (!%p2239_p3)
}
  0x4b   : > { %s2409_s21 = smov 128   ;;  %s2410_s27 = smov 8  }
  0x4c   : > { %2091 = dma.hbm_to_vmem [thread:$0]  (!%p3246_p8), %s2584_s6, 2048, %s2586_s4, %s2588_s2, %s2409_s21, %s2409_s21, %s2410_s27  }
  0x4d   : > { %s3248_s28 = sand.u32 1, %s2399_s23   ;;  %s3229_s15 = sshll.u32 %s2403_s24, 10 }
  0x4e   : > { %s2620_s3 = sshll.u32 %s3248_s28, 6  ;;  %s2628_s30 = scalar_lea.hbm %s3211_s8, %s3229_s15 }
  0x4f   : > { %s407_s12 = scalar_lea.vmem [#allocation9], %s2620_s3  ;;  %s2411_s4 = smov [#allocation6]  }
  0x50   : > { %s414_s29 = sshll.u32 %s407_s12, 4  ;;  %s2633_s6 = sshll.u32 %s2411_s4, 4  ;;  %s2631_s29 = int_to_ptr.vmem [resolvable:$true] %s414_s29  ;;  %s366_s6 = int_to_ptr.vmem [resolvable:$true] %s2633_s6 }
  0x51   : > { %s2243_s21 = scalar_lea.hbm %s2628_s30, 1024  ;;  %s2248_s18 = scalar_lea.hbm %s3211_s8, 3072 }
  0x52   : > { %p2244_p12 = scmp.ne.s32.totalorder %s2628_s30, %s2243_s21  ;;  %p2249_p6 = scmp.lt.u32.totalorder %s2628_s30, %s3211_s8 }
  0x53   : > { %p2250_p4 = scmp.lt.u32.totalorder %s2248_s18, %s2243_s21  ;;  %p2252_p11 = scmp.lt.u32.totalorder %s2243_s21, %s2628_s30 }
  0x54   : > { %p2246_p2 = pnand %p2244_p12, %p2594_p9 }
  0x55   : > { %p2251_p7 = por %p2250_p4, %p2249_p6 }
  0x56   : > { %p2247_p0 = pneg %p2246_p2 }
  0x57   : > { %p2253_p13 = por %p2252_p11, %p2251_p7 }
  0x59   : > { %p2254_p5 = pnand %p2253_p13, %p2247_p0 }
  0x5b   : > { %2257 = shalt.err (!%p2254_p5)
}
  0x5c   : > { %s2258_s12 = scalar_lea.vmem %s2631_s29, 1024  ;;  %s2412_s4 = smov [#allocation9]  }
  0x5d   : > { %p2259_p10 = scmp.ne.s32.totalorder %s2631_s29, %s2258_s12  ;;  %s2263_s27 = sshll.u32 %s2412_s4, 4  ;;  %s2264_s27 = int_to_ptr.vmem [resolvable:$false] %s2263_s27 }
  0x5e   : > { %s2265_s15 = scalar_lea.vmem %s2264_s27, 2048  ;;  %p2266_p12 = scmp.lt.s32.totalorder %s2631_s29, %s2264_s27 }
  0x5f   : > { %p2261_p1 = pnand %p2259_p10, %p2594_p9  ;;  %p2267_p2 = scmp.lt.s32.totalorder %s2265_s15, %s2258_s12 }
  0x61   : > { %p2262_p3 = pneg %p2261_p1  ;;  %p2268_p6 = por %p2267_p2, %p2266_p12 }
  0x63   : > { %p2269_p4 = pnand %p2268_p6, %p2262_p3 }
  0x65   : > { %2272 = shalt.err (!%p2269_p4)
}
  0x66   : > { %s3249_s21 = smov 64   ;;  %s2273_s26 = scalar_lea.hbm %s3208_s5, 1024 }
  0x67   : > { %2094 = dma.hbm_to_vmem [thread:$0]  (!%p3246_p8), %s2628_s30, 1024, %s2631_s29, %s2588_s2, %s3249_s21, %s3249_s21, %s2407_s19  }
  0x68   : > { %p2274_p0 = scmp.ne.s32.totalorder %s3208_s5, %s2273_s26  ;;  %p3250_p7 = scmp.ne.s32.totalorder %s3243_s17, 0 }
  0x69   : > { %p2280_p10 = scmp.lt.u32.totalorder %s2273_s26, %s3208_s5 }
  0x6a   : > { %p3251_p11 = pneg %p3250_p7 }
  0x6c   : > { %p2276_p13 = pnand %p2274_p0, %p3251_p11 }
  0x6e   : > { %p2277_p5 = pneg %p2276_p13 }
  0x70   : > { %p2282_p1 = pnand %p2280_p10, %p2277_p5 }
  0x72   : > { %2285 = shalt.err (!%p2282_p1)
}
  0x73   : > { %s2286_s29 = scalar_lea.vmem %s366_s6, 1024  ;;  %p3252_p12 = pmov %p3251_p11 }
  0x74   : > { %p2287_p3 = scmp.ne.s32.totalorder %s366_s6, %s2286_s29  ;;  %p2294_p4 = scmp.lt.s32.totalorder %s366_s6, %s366_s6 }
  0x75   : > { %p2295_p8 = scmp.lt.s32.totalorder %s2286_s29, %s2286_s29 }
  0x76   : > { %p2289_p2 = pnand %p2287_p3, %p3252_p12 }
  0x77   : > { %p2296_p9 = por %p2295_p8, %p2294_p4 }
  0x78   : > { %p2290_p6 = pneg %p2289_p2 }
  0x7a   : > { %p2297_p0 = pnand %p2296_p9, %p2290_p6 }
  0x7c   : > { %2300 = shalt.err (!%p2297_p0)
}
  0x7d   : > { %2087 = dma.hbm_to_vmem [thread:$0]  (!%p3250_p7), %s3208_s5, 1024, %s366_s6, [#allocation7], %s3249_s21, %s3249_s21, %s2407_s19  }
  0x7e   : > { %s3253_s18 = sshll.u32 %s2403_s24, 10  ;;  %s434_s17 = scalar_lea.vmem [#allocation10], %s2620_s3 }
  0x7f   : > { %s2689_s4 = scalar_lea.hbm %s3213_s10, %s3253_s18  ;;  %s441_s27 = sshll.u32 %s434_s17, 4  ;;  %s2692_s27 = int_to_ptr.vmem [resolvable:$true] %s441_s27 }
  0x80   : > { %s2301_s15 = scalar_lea.hbm %s2689_s4, 1024  ;;  %p3254_p9 = scmp.ne.s32.totalorder %s3247_s16, 0 }
  0x81   : > { %p2302_p8 = scmp.ne.s32.totalorder %s2689_s4, %s2301_s15  ;;  %s2306_s29 = scalar_lea.hbm %s3213_s10, 3072 }
  0x82   : > { %p2307_p7 = scmp.lt.u32.totalorder %s2689_s4, %s3213_s10  ;;  %p2308_p5 = scmp.lt.u32.totalorder %s2306_s29, %s2301_s15 }
  0x83   : > { %p2304_p11 = pnand %p2302_p8, %p3254_p9  ;;  %p2310_p1 = scmp.lt.u32.totalorder %s2301_s15, %s2689_s4 }
  0x84   : > { %p2309_p10 = por %p2308_p5, %p2307_p7 }
  0x85   : > { %p2305_p13 = pneg %p2304_p11 }
  0x86   : > { %p2311_p3 = por %p2310_p1, %p2309_p10 }
  0x88   : > { %p2312_p12 = pnand %p2311_p3, %p2305_p13 }
  0x8a   : > { %2315 = shalt.err (!%p2312_p12)
}
  0x8b   : > { %s2316_s3 = scalar_lea.vmem %s2692_s27, 1024  ;;  %s2413_s18 = smov [#allocation10]  }
  0x8c   : > { %p2317_p2 = scmp.ne.s32.totalorder %s2692_s27, %s2316_s3  ;;  %s2321_s26 = sshll.u32 %s2413_s18, 4  ;;  %s2322_s26 = int_to_ptr.vmem [resolvable:$false] %s2321_s26 }
  0x8d   : > { %s2323_s12 = scalar_lea.vmem %s2322_s26, 2048  ;;  %p2324_p0 = scmp.lt.s32.totalorder %s2692_s27, %s2322_s26 }
  0x8e   : > { %p2319_p6 = pnand %p2317_p2, %p3254_p9  ;;  %p2325_p8 = scmp.lt.s32.totalorder %s2323_s12, %s2316_s3 }
  0x90   : > { %p2320_p4 = pneg %p2319_p6  ;;  %p2326_p11 = por %p2325_p8, %p2324_p0 }
  0x92   : > { %p2327_p7 = pnand %p2326_p11, %p2320_p4 }
  0x94   : > { %2330 = shalt.err (!%p2327_p7)
}
  0x95   : > { %p3255_p13 = scmp.ne.s32.totalorder %s3244_s20, 0  ;;  %p3256_p9 = scmp.ne.s32.totalorder %s3242_s14, 0 }
  0x96   : > { %p3257_p5 = scmp.eq.s32.totalorder (!%p3256_p9), %s2503_s25, 0 }
  0x97   : > { %2097 = dma.hbm_to_vmem [thread:$0]  (!%p3255_p13), %s2689_s4, 1024, %s2692_s27, %s2588_s2, %s3249_s21, %s3249_s21, %s2407_s19  }
  0x98   : > { %460 = sbr.rel (%p3256_p9) target bundleno = 1508 (0x5e4), region = 68 }
  0x9f   : > { %2374 = dma.done.wait (%p3257_p5), [#allocation4], 1024   ;;  %p3258_p10 = pmov %p3257_p5 }
  0xa0   : > { %p3259_p1 = pmov %p3257_p5 }
  0xa1   : > { %2376 = vsyncadd (%p3258_p10), [#allocation4], 4294966272 }
  0xa2   : > { %2378 = dma.done.wait (%p3259_p1), [#allocation7], 1024   ;;  %p3260_p3 = pmov %p3259_p1 }
  0xa3   : > { %s470_s20 = sand.u32 1, %s2503_s25   ;;  %s472_s2 = sand.u32 1, %s2395_s22  }
  0xa4   : > { %2380 = vsyncadd (%p3260_p3), [#allocation7], 4294966272  ;;  %s1797_s19 = sshll.u32 %s472_s2, 7  ;;  %s471_s14 = scalar_lea.sflag [#allocation4], %s470_s20 }
  0xa5   : > { %s2731_s16 = scalar_lea.vmem [#allocation8], %s1797_s19  ;;  %p3261_p12 = scmp.ne.s32.totalorder %s3241_s13, 0 }
  0xa7   : > { %2382 = dma.done.wait (%p3261_p12), %s471_s14, 4096  }
  0xa8   : > { %2384 = vsyncadd (%p3261_p12), %s471_s14, 4294963200  ;;  %s1798_s21 = sshll.u32 %s472_s2, 6  ;;  %p545_p2 = scmp.lt.s32.totalorder %s2503_s25, 2 }
  0xa9   : > { %s2751_s13 = scalar_lea.vmem [#allocation9], %s1798_s21  ;;  %s2753_s28 = scalar_lea.vmem [#allocation10], %s1798_s21 }
  0xaa   : > { %s2739_s4 = scalar_select %p545_p2, %s2503_s25, 2 }
  0xab   : > { %p3262_p6 = scmp.ne.s32.totalorder %s2503_s25, 0 }
  0xac   : > { %s547_s15 = scalar_lea.vmem %s3212_s9, %s2739_s4  ;;  %s1800_s6 = sshll.u32 %s2739_s4, 2  ;;  %v558_v0 = vld [vmem:[%s3203_s0] sm:$0xff] (!%p3262_p6)  ;;  %v559_v1 = vld [vmem:[%s3203_s0 + $0x8] sm:$0xff] (!%p3262_p6)  ;;  %v560_v2 = vld [vmem:[%s3203_s0 + $0x10] sm:$0xff] (!%p3262_p6) }
  0xad   : > { %s2749_s30 = scalar_lea.vmem %s3214_s11, %s1800_s6  ;;  %557 = sbr.rel (%p3262_p6) target bundleno = 181 (0xb5), region = 92  ;;  %574 = vst [vmem:[#allocation2] sm:$0xff] (!%p3262_p6), %v558_v0  ;;  %575 = vst [vmem:[#allocation2 + $0x8] sm:$0xff] (!%p3262_p6), %v559_v1  ;;  %v561_v3 = vld [vmem:[%s3203_s0 + $0x18] sm:$0xff] (!%p3262_p6)  ;;  %v562_v4 = vld [vmem:[%s3203_s0 + $0x20] sm:$0xff] (!%p3262_p6) }
  0xae   : > { %576 = vst [vmem:[#allocation2 + $0x10] sm:$0xff] (!%p3262_p6), %v560_v2  ;;  %v563_v5 = vld [vmem:[%s3203_s0 + $0x28] sm:$0xff] (!%p3262_p6)  ;;  %577 = vst [vmem:[#allocation2 + $0x18] sm:$0xff] (!%p3262_p6), %v561_v3  ;;  %v564_v6 = vld [vmem:[%s3203_s0 + $0x30] sm:$0xff] (!%p3262_p6) }
  0xaf   : > { %578 = vst [vmem:[#allocation2 + $0x20] sm:$0xff] (!%p3262_p6), %v562_v4  ;;  %579 = vst [vmem:[#allocation2 + $0x28] sm:$0xff] (!%p3262_p6), %v563_v5  ;;  %v565_v7 = vld [vmem:[%s3203_s0 + $0x38] sm:$0xff] (!%p3262_p6)  ;;  %v566_v8 = vld [vmem:[%s3203_s0 + $0x40] sm:$0xff] (!%p3262_p6) }
  0xb0   : > { %580 = vst [vmem:[#allocation2 + $0x30] sm:$0xff] (!%p3262_p6), %v564_v6  ;;  %581 = vst [vmem:[#allocation2 + $0x38] sm:$0xff] (!%p3262_p6), %v565_v7  ;;  %v567_v9 = vld [vmem:[%s3203_s0 + $0x48] sm:$0xff] (!%p3262_p6)  ;;  %v568_v10 = vld [vmem:[%s3203_s0 + $0x50] sm:$0xff] (!%p3262_p6) }
  0xb1   : > { %582 = vst [vmem:[#allocation2 + $0x40] sm:$0xff] (!%p3262_p6), %v566_v8  ;;  %v569_v11 = vld [vmem:[%s3203_s0 + $0x58] sm:$0xff] (!%p3262_p6)  ;;  %583 = vst [vmem:[#allocation2 + $0x48] sm:$0xff] (!%p3262_p6), %v567_v9  ;;  %v570_v12 = vld [vmem:[%s3203_s0 + $0x60] sm:$0xff] (!%p3262_p6) }
  0xb2   : > { %584 = vst [vmem:[#allocation2 + $0x50] sm:$0xff] (!%p3262_p6), %v568_v10  ;;  %585 = vst [vmem:[#allocation2 + $0x58] sm:$0xff] (!%p3262_p6), %v569_v11  ;;  %v571_v13 = vld [vmem:[%s3203_s0 + $0x68] sm:$0xff] (!%p3262_p6)  ;;  %v572_v14 = vld [vmem:[%s3203_s0 + $0x70] sm:$0xff] (!%p3262_p6) }
  0xb3   : > { %586 = vst [vmem:[#allocation2 + $0x60] sm:$0xff] (!%p3262_p6), %v570_v12  ;;  %587 = vst [vmem:[#allocation2 + $0x68] sm:$0xff] (!%p3262_p6), %v571_v13  ;;  %v573_v15 = vld [vmem:[%s3203_s0 + $0x78] sm:$0xff] (!%p3262_p6) }
  0xb4   : > { %588 = vst [vmem:[#allocation2 + $0x70] sm:$0xff] %v572_v14  ;;  %589 = vst [vmem:[#allocation2 + $0x78] sm:$0xff] %v573_v15 }
  0xb5 PF: > { %v590_v16 = vld [vmem:[#allocation2] sm:$0xff]  ;;  %v591_v17 = vld [vmem:[#allocation2 + $0x8] sm:$0xff]  ;;  %v2160_v39 = vld [vmem:[%s2751_s13 + $0x10] sm:$0xff]   ;;  %s3263_s20 = sld [smem:[#allocation18_spill]]  ;;  %p1827_p4 = scmp.eq.s32.totalorder %s2503_s25, 2 }
  0xb6   : > { %v592_v18 = vld [vmem:[#allocation2 + $0x10] sm:$0xff]  ;;  %v622_v19 = vpack.c.bf16 %v591_v17, %v590_v16  ;;  %v593_v20 = vld [vmem:[#allocation2 + $0x18] sm:$0xff]  ;;  %v2150_v27 = vld [vmem:[#allocation3] sm:$0xff]  }
  0xb7   : > { %v623_v21 = vpack.c.bf16 %v593_v20, %v592_v18  ;;  %v594_v22 = vld [vmem:[#allocation2 + $0x20] sm:$0xff]  ;;  %v595_v23 = vld [vmem:[#allocation2 + $0x28] sm:$0xff]  ;;  %1927 = vmatprep.mubr.bf16.mxu0 %v2150_v27  ;;  %v2161_v42 = vld [vmem:[%s2751_s13 + $0x18] sm:$0xff]  }
  0xb8   : > { %1911 = vmatprep.subr.bf16.mxu0 %v622_v19  ;;  %v596_v24 = vld [vmem:[#allocation2 + $0x30] sm:$0xff]  ;;  %v624_v25 = vpack.c.bf16 %v595_v23, %v594_v22  ;;  %v597_v26 = vld [vmem:[#allocation2 + $0x38] sm:$0xff]  ;;  %v2158_v34 = vld [vmem:[%s2751_s13] sm:$0xff]  }
  0xb9   : > { %1912 = vmatpush3.bf16.msra.mxu0 %v622_v19  ;;  %v625_v28 = vpack.c.bf16 %v597_v26, %v596_v24  ;;  %v598_v29 = vld [vmem:[#allocation2 + $0x40] sm:$0xff]  ;;  %v599_v30 = vld [vmem:[#allocation2 + $0x48] sm:$0xff]  ;;  %1943 = vmatprep.subr.bf16.mxu1 %v2158_v34  ;;  %v2152_v48 = vld [vmem:[#allocation3 + $0x10] sm:$0xff]  }
  0xba   : > { %1913 = vmatprep.subr.bf16.mxu0 %v623_v21  ;;  %v600_v31 = vld [vmem:[#allocation2 + $0x50] sm:$0xff]  ;;  %v626_v32 = vpack.c.bf16 %v599_v30, %v598_v29  ;;  %v601_v33 = vld [vmem:[#allocation2 + $0x58] sm:$0xff]  ;;  %v2159_v35 = vld [vmem:[%s2751_s13 + $0x8] sm:$0xff]   ;;  %1944 = vmatpush3.bf16.msra.mxu1 %v2158_v34 }
  0xbb   : > { %v602_v36 = vld [vmem:[#allocation2 + $0x60] sm:$0xff]  ;;  %v627_v37 = vpack.c.bf16 %v601_v33, %v600_v31  ;;  %v603_v38 = vld [vmem:[#allocation2 + $0x68] sm:$0xff]  ;;  %1945 = vmatprep.subr.bf16.mxu1 %v2159_v35  ;;  %v604_v40 = vld [vmem:[#allocation2 + $0x70] sm:$0xff] }
  0xbc   : > { %v605_v41 = vld [vmem:[#allocation2 + $0x78] sm:$0xff]  ;;  %v628_v43 = vpack.c.bf16 %v603_v38, %v602_v36  ;;  %v2162_v45 = vld [vmem:[%s2751_s13 + $0x20] sm:$0xff]   ;;  %v2163_v46 = vld [vmem:[%s2751_s13 + $0x28] sm:$0xff]  }
  0xbd   : > { %1914 = vmatpush3.bf16.msra.mxu0 %v623_v21  ;;  %v629_v44 = vpack.c.bf16 %v605_v41, %v604_v40  ;;  %v2151_v47 = vld [vmem:[#allocation3 + $0x8] sm:$0xff]   ;;  %v2153_v49 = vld [vmem:[#allocation3 + $0x18] sm:$0xff]   ;;  %v2154_v50 = vld [vmem:[#allocation3 + $0x20] sm:$0xff]  }
  0xbe   : > { %1915 = vmatprep.subr.bf16.mxu0 %v624_v25  ;;  %1946 = vmatpush3.bf16.msra.mxu1 %v2159_v35  ;;  %v2155_v51 = vld [vmem:[#allocation3 + $0x28] sm:$0xff]   ;;  %v2156_v52 = vld [vmem:[#allocation3 + $0x30] sm:$0xff]   ;;  %v2157_v53 = vld [vmem:[#allocation3 + $0x38] sm:$0xff]  }
  0xbf   : > { %1947 = vmatprep.subr.bf16.mxu1 %v2160_v39  ;;  %v2164_v54 = vld [vmem:[%s2751_s13 + $0x30] sm:$0xff]   ;;  %v2165_v55 = vld [vmem:[%s2751_s13 + $0x38] sm:$0xff]   ;;  %v2166_v56 = vld [vmem:[%s2753_s28] sm:$0xff]  }
  0xc0   : > { %v2167_v57 = vld [vmem:[%s2753_s28 + $0x8] sm:$0xff]   ;;  %v2168_v58 = vld [vmem:[%s2753_s28 + $0x10] sm:$0xff]   ;;  %v2169_v59 = vld [vmem:[%s2753_s28 + $0x18] sm:$0xff]  }
  0xc1   : > { %1916 = vmatpush3.bf16.msra.mxu0 %v624_v25  ;;  %v2818_v60 = vld [vmem:[%s2753_s28 + $0x20] sm:$0xff]   ;;  %v2822_v61 = vld [vmem:[%s2753_s28 + $0x28] sm:$0xff]   ;;  %v632_v62 = vld [vmem:[%s2731_s16 + $0x10] sm:$0xff] }
  0xc2   : > { %1917 = vmatprep.subr.bf16.mxu0 %v625_v28  ;;  %1948 = vmatpush3.bf16.msra.mxu1 %v2160_v39  ;;  %v633_v0 = vld [vmem:[%s2731_s16 + $0x18] sm:$0xff]  ;;  %v630_v2 = vld [vmem:[%s2731_s16] sm:$0xff]  ;;  %v631_v3 = vld [vmem:[%s2731_s16 + $0x8] sm:$0xff] }
  0xc3   : > { %1949 = vmatprep.subr.bf16.mxu1 %v2161_v42  ;;  %v636_v12 = vld [vmem:[%s2731_s16 + $0x30] sm:$0xff]  ;;  %v637_v14 = vld [vmem:[%s2731_s16 + $0x38] sm:$0xff]  ;;  %v634_v16 = vld [vmem:[%s2731_s16 + $0x20] sm:$0xff] }
  0xc4   : > { %v635_v17 = vld [vmem:[%s2731_s16 + $0x28] sm:$0xff]  ;;  %v640_v26 = vld [vmem:[%s2731_s16 + $0x50] sm:$0xff]  ;;  %v638_v30 = vld [vmem:[%s2731_s16 + $0x40] sm:$0xff] }
  0xc5   : > { %1918 = vmatpush3.bf16.msra.mxu0 %v625_v28  ;;  %v641_v28 = vld [vmem:[%s2731_s16 + $0x58] sm:$0xff]  ;;  %v639_v31 = vld [vmem:[%s2731_s16 + $0x48] sm:$0xff]  ;;  %v644_v40 = vld [vmem:[%s2731_s16 + $0x70] sm:$0xff] }
  0xc6   : > { %1919 = vmatprep.subr.bf16.mxu0 %v626_v32  ;;  %1950 = vmatpush3.bf16.msra.mxu1 %v2161_v42  ;;  %v645_v42 = vld [vmem:[%s2731_s16 + $0x78] sm:$0xff] }
  0xc7   : > { %1951 = vmatprep.subr.bf16.mxu1 %v2162_v45 }
  0xc9   : > { %1920 = vmatpush3.bf16.msra.mxu0 %v626_v32 }
  0xca   : > { %1921 = vmatprep.subr.bf16.mxu0 %v627_v37  ;;  %1952 = vmatpush3.bf16.msra.mxu1 %v2162_v45  ;;  %v643_v45 = vld [vmem:[%s2731_s16 + $0x68] sm:$0xff] }
  0xcb   : > { %1953 = vmatprep.subr.bf16.mxu1 %v2163_v46 }
  0xcd   : > { %1922 = vmatpush3.bf16.msra.mxu0 %v627_v37 }
  0xce   : > { %1923 = vmatprep.subr.bf16.mxu0 %v628_v43  ;;  %1954 = vmatpush3.bf16.msra.mxu1 %v2163_v46 }
  0xcf   : > { %1955 = vmatprep.subr.bf16.mxu1 %v2164_v54 }
  0xd1   : > { %1924 = vmatpush3.bf16.msra.mxu0 %v628_v43 }
  0xd2   : > { %1925 = vmatprep.subr.bf16.mxu0 %v629_v44  ;;  %1956 = vmatpush3.bf16.msra.mxu1 %v2164_v54  ;;  %v2172_v54 = vld [vmem:[%s2753_s28 + $0x30] sm:$0xff]  }
  0xd3   : > { %1957 = vmatprep.subr.bf16.mxu1 %v2165_v55 }
  0xd5   : > { %1926 = vmatpush3.bf16.msra.mxu0 %v629_v44  ;;  %v642_v44 = vld [vmem:[%s2731_s16 + $0x60] sm:$0xff] }
  0xd6   : > { %1958 = vmatpush3.bf16.msra.mxu1 %v2165_v55  ;;  %1975 = vmatprep.subr.bf16.mxu0 %v2166_v56  ;;  %v2173_v55 = vld [vmem:[%s2753_s28 + $0x38] sm:$0xff]  }
  0xd7   : > { %2047 = vmatprep.subr.bf16.mxu1 %v2166_v56 }
  0xd8   : > { %1928 = vmatmul.mubr.bf16.vlgmr.msra.gmra.mrb[0].mxu0 %v2151_v47 }
  0xd9   : > { %1931 = vmatprep.mubr.bf16.mxu0 %v2152_v48  ;;  %1976 = vmatpush3.bf16.msra.mxu0 %v2166_v56 }
  0xda   : > { %1977 = vmatprep.subr.bf16.mxu0 %v2167_v57 }
  0xdd   : > { %1978 = vmatpush3.bf16.msra.mxu0 %v2167_v57 }
  0xde   : > { %1979 = vmatprep.subr.bf16.mxu0 %v2168_v58 }
  0xe0   : > { %1932 = vmatmul.mubr.bf16.gmra.mrb[4].mxu0 %v2153_v49 }
  0xe1   : > { %1935 = vmatprep.mubr.bf16.mxu0 %v2154_v50  ;;  %1980 = vmatpush3.bf16.msra.mxu0 %v2168_v58 }
  0xe2   : > { %1981 = vmatprep.subr.bf16.mxu0 %v2169_v59 }
  0xe5   : > { %1982 = vmatpush3.bf16.msra.mxu0 %v2169_v59 }
  0xe6   : > { %1983 = vmatprep.subr.bf16.mxu0 %v2818_v60 }
  0xe8   : > { %1936 = vmatmul.mubr.bf16.gmra.mrb[8].mxu0 %v2155_v51 }
  0xe9   : > { %1939 = vmatprep.mubr.bf16.mxu0 %v2156_v52  ;;  %1984 = vmatpush3.bf16.msra.mxu0 %v2818_v60 }
  0xea   : > { %1985 = vmatprep.subr.bf16.mxu0 %v2822_v61 }
  0xed   : > { %1986 = vmatpush3.bf16.msra.mxu0 %v2822_v61 }
  0xee   : > { %1987 = vmatprep.subr.bf16.mxu0 %v2172_v54 }
  0xf0   : > { %1940 = vmatmul.mubr.bf16.gmra.mrb[12].mxu0 %v2157_v53 }
  0xf1   : > { %1988 = vmatpush3.bf16.msra.mxu0 %v2172_v54 }
  0xf2   : > { %1989 = vmatprep.subr.bf16.mxu0 %v2173_v55 }
  0xf5   : > { %1990 = vmatpush3.bf16.msra.mxu0 %v2173_v55 }
 0x1ab   : > { %v1929_v63 = vpop.f32.mrb[0].mxu0 }
 0x1ac   : > { %v728_v1 = vpop.f32.mrb[1].mxu0  ;;  %v737_v5 = vadd.f32 %v1929_v63, %v632_v62  ;;  %v1162_v62 = vld [vmem:[%s3263_s20 + $0x28] sm:$0xff]  ;;  %v1163_v63 = vld [vmem:[%s3263_s20 + $0x30] sm:$0xff] }
 0x1ad   : > { %v1930_v4 = vpop.f32.mrb[2].mxu0  ;;  %v729_v8 = vadd.f32 %v728_v1, %v630_v2  ;;  %v1165_v1 = vld [vmem:[%s3263_s20 + $0x40] sm:$0xff]  ;;  %v1166_v2 = vld [vmem:[%s3263_s20 + $0x48] sm:$0xff] }
 0x1ae   : > { %v740_v6 = vadd.f32 %v1930_v4, %v633_v0  ;;  %v731_v7 = vpop.f32.mrb[3].mxu0  ;;  %v1164_v0 = vld [vmem:[%s3263_s20 + $0x38] sm:$0xff] }
 0x1af   : > { %v732_v9 = vadd.f32 %v731_v7, %v631_v3  ;;  %v1167_v3 = vld [vmem:[%s3263_s20 + $0x50] sm:$0xff]  ;;  %v1168_v4 = vld [vmem:[%s3263_s20 + $0x58] sm:$0xff] }
 0x1b0   : > { %v792_v10 = vpack.c.bf16 %v740_v6, %v737_v5  ;;  %v1169_v5 = vld [vmem:[%s3263_s20 + $0x60] sm:$0xff]  ;;  %v1170_v6 = vld [vmem:[%s3263_s20 + $0x68] sm:$0xff]  ;;  %v1171_v7 = vld [vmem:[%s3263_s20 + $0x70] sm:$0xff] }
 0x1b1   : > { %v791_v11 = vpack.c.bf16 %v732_v9, %v729_v8  ;;  %v1172_v8 = vld [vmem:[%s3263_s20 + $0x78] sm:$0xff]  ;;  %v1810_v9 = vld [vmem:[%s547_s15] ss:$0 sm:$0xff] }
 0x1b3   : > { %v1933_v13 = vpop.f32.mrb[4].mxu0  ;;  %1959 = vmatprep.mubr.bf16.mxu1 %v791_v11 }
 0x1b4   : > { %v744_v15 = vpop.f32.mrb[5].mxu0  ;;  %1960 = vmatmul.mubr.bf16.vlgmr.msra.gmra.mrb[0].mxu1 %v792_v10  ;;  %v753_v19 = vadd.f32 %v1933_v13, %v636_v12 }
 0x1b5   : > { %v1934_v18 = vpop.f32.mrb[6].mxu0  ;;  %2055 = vmatpush3.bf16.msra.mxu1 %v2166_v56  ;;  %v745_v22 = vadd.f32 %v744_v15, %v634_v16  ;;  %v1157_v56 = vld [vmem:[%s3263_s20] sm:$0xff] }
 0x1b6   : > { %v756_v20 = vadd.f32 %v1934_v18, %v637_v14  ;;  %v747_v21 = vpop.f32.mrb[7].mxu0  ;;  %2048 = vmatprep.subr.bf16.mxu1 %v2167_v57 }
 0x1b7   : > { %v748_v23 = vadd.f32 %v747_v21, %v635_v17 }
 0x1b8   : > { %v794_v24 = vpack.c.bf16 %v756_v20, %v753_v19 }
 0x1b9   : > { %v793_v25 = vpack.c.bf16 %v748_v23, %v745_v22  ;;  %2056 = vmatpush3.bf16.msra.mxu1 %v2167_v57  ;;  %v1159_v57 = vld [vmem:[%s3263_s20 + $0x10] sm:$0xff] }
 0x1ba   : > { %2049 = vmatprep.subr.bf16.mxu1 %v2168_v58 }
 0x1bb   : > { %v1937_v27 = vpop.f32.mrb[8].mxu0  ;;  %1963 = vmatprep.mubr.bf16.mxu1 %v793_v25 }
 0x1bc   : > { %v760_v29 = vpop.f32.mrb[9].mxu0  ;;  %1964 = vmatmul.mubr.bf16.gmra.mrb[4].mxu1 %v794_v24  ;;  %v769_v33 = vadd.f32 %v1937_v27, %v640_v26 }
 0x1bd   : > { %v1938_v32 = vpop.f32.mrb[10].mxu0  ;;  %2057 = vmatpush3.bf16.msra.mxu1 %v2168_v58  ;;  %v761_v36 = vadd.f32 %v760_v29, %v638_v30  ;;  %v2414_v58 = vmov 0  }
 0x1be   : > { %v772_v34 = vadd.f32 %v1938_v32, %v641_v28  ;;  %v763_v35 = vpop.f32.mrb[11].mxu0  ;;  %2050 = vmatprep.subr.bf16.mxu1 %v2169_v59  ;;  %2148 = vset.pattern.permute.xlu0 %v2414_v58 }
 0x1bf   : > { %v764_v37 = vadd.f32 %v763_v35, %v639_v31  ;;  %2149 = vset.pattern.permute.xlu1 %v2414_v58  ;;  %1175 = vperm.xlu0 %2148, %v1157_v56  }
 0x1c0   : > { %v796_v38 = vpack.c.bf16 %v772_v34, %v769_v33  ;;  %1185 = vperm.xlu1 %2149, %v1159_v57  }
 0x1c1   : > { %v795_v39 = vpack.c.bf16 %v764_v37, %v761_v36  ;;  %2058 = vmatpush3.bf16.msra.mxu1 %v2169_v59  ;;  %v1158_v59 = vld [vmem:[%s3263_s20 + $0x8] sm:$0xff] }
 0x1c2   : > { %2051 = vmatprep.subr.bf16.mxu1 %v2818_v60 }
 0x1c3   : > { %v1941_v41 = vpop.f32.mrb[12].mxu0  ;;  %1967 = vmatprep.mubr.bf16.mxu1 %v795_v39  ;;  %1180 = vperm.xlu0 %2148, %v1158_v59  }
 0x1c4   : > { %v776_v43 = vpop.f32.mrb[13].mxu0  ;;  %1968 = vmatmul.mubr.bf16.gmra.mrb[8].mxu1 %v796_v38  ;;  %v785_v47 = vadd.f32 %v1941_v41, %v644_v40 }
 0x1c5   : > { %v1942_v46 = vpop.f32.mrb[14].mxu0  ;;  %2059 = vmatpush3.bf16.msra.mxu1 %v2818_v60  ;;  %v777_v50 = vadd.f32 %v776_v43, %v642_v44  ;;  %v1160_v60 = vld [vmem:[%s3263_s20 + $0x18] sm:$0xff] }
 0x1c6   : > { %v788_v48 = vadd.f32 %v1942_v46, %v645_v42  ;;  %v779_v49 = vpop.f32.mrb[15].mxu0  ;;  %2052 = vmatprep.subr.bf16.mxu1 %v2822_v61  ;;  %1190 = vperm.xlu1 %2149, %v1160_v60  }
 0x1c7   : > { %v780_v51 = vadd.f32 %v779_v49, %v643_v45 }
 0x1c8   : > { %v798_v52 = vpack.c.bf16 %v788_v48, %v785_v47 }
 0x1c9   : > { %v797_v53 = vpack.c.bf16 %v780_v51, %v777_v50  ;;  %2060 = vmatpush3.bf16.msra.mxu1 %v2822_v61  ;;  %v1161_v61 = vld [vmem:[%s3263_s20 + $0x20] sm:$0xff] }
 0x1ca   : > { %2053 = vmatprep.subr.bf16.mxu1 %v2172_v54  ;;  %1195 = vperm.xlu0 %2148, %v1161_v61  }
 0x1cb   : > { %1971 = vmatprep.mubr.bf16.mxu1 %v797_v53  ;;  %1200 = vperm.xlu1 %2149, %v1162_v62  }
 0x1cc   : > { %1972 = vmatmul.mubr.bf16.gmra.mrb[12].mxu1 %v798_v52 }
 0x1cd   : > { %2061 = vmatpush3.bf16.msra.mxu1 %v2172_v54 }
 0x1ce   : > { %2054 = vmatprep.subr.bf16.mxu1 %v2173_v55  ;;  %1205 = vperm.xlu0 %2148, %v1163_v63  }
 0x1cf   : > { %1210 = vperm.xlu1 %2149, %v1164_v0  }
 0x1d1   : > { %2062 = vmatpush3.bf16.msra.mxu1 %v2173_v55 }
 0x1d2   : > { %1215 = vperm.xlu0 %2148, %v1165_v1  }
 0x1d3   : > { %1220 = vperm.xlu1 %2149, %v1166_v2   ;;  %v1008_v2 = vlaneseq }
 0x1d6   : > { %1225 = vperm.xlu0 %2148, %v1167_v3  }
 0x1d7   : > { %1230 = vperm.xlu1 %2149, %v1168_v4   ;;  %v2904_v4 = vshrl.u32 %v1008_v2, 7 }
 0x1da   : > { %1235 = vperm.xlu0 %2148, %v1169_v5  }
 0x1db   : > { %1240 = vperm.xlu1 %2149, %v1170_v6   ;;  %v1010_v6 = vsub.s32 0, %v2904_v4 }
 0x1de   : > { %1245 = vperm.xlu0 %2148, %v1171_v7  }
 0x1df   : > { %1250 = vperm.xlu1 %2149, %v1172_v8   ;;  %v2912_v8 = vld [vmem:[%s2749_s30] sm:$0x7] }
 0x23e   : > { %v2902_v3 = vpop.permute.xlu0 %1175 }
 0x23f   : > { %v2906_v5 = vpop.permute.xlu1 %1185 }
 0x242   : > { %v2909_v7 = vpop.permute.xlu0 %1180 }
 0x287   : > { %v1961_v10 = vpop.f32.mrb[0].mxu1 }
 0x288   : > { %v913_v11 = vadd.f32 %v1961_v10, %v1810_v9  ;;  %v904_v12 = vpop.f32.mrb[1].mxu1  ;;  %v2917_v10 = vrot.slane %v2912_v8, %v1010_v6 }
 0x289   : > { %v905_v13 = vadd.f32 %v1810_v9, %v904_v12  ;;  %v1962_v14 = vpop.f32.mrb[2].mxu1  ;;  %v2919_v12 = vpop.permute.xlu0 %1195 }
 0x28a   : > { %v916_v15 = vadd.f32 %v1962_v14, %v1810_v9  ;;  %v907_v16 = vpop.f32.mrb[3].mxu1  ;;  %v969_v18 = vmax.f32 %v913_v11, 0.0 }
 0x28b   : > { %v908_v17 = vadd.f32 %v1810_v9, %v907_v16  ;;  %v967_v20 = vmax.f32 %v905_v13, 0.0 }
 0x28c   : > { %v970_v19 = vmax.f32 %v916_v15, 0.0 }
 0x28d   : > { %v968_v21 = vmax.f32 %v908_v17, 0.0 }
 0x28e   : > { %v985_v22 = vpack.c.bf16 %v970_v19, %v969_v18 }
 0x28f   : > { %v984_v23 = vpack.c.bf16 %v968_v21, %v967_v20  ;;  %v1965_v24 = vpop.f32.mrb[4].mxu1 }
 0x290   : > { %v929_v25 = vadd.f32 %v1965_v24, %v1810_v9  ;;  %v920_v26 = vpop.f32.mrb[5].mxu1 }
 0x291   : > { %v921_v27 = vadd.f32 %v1810_v9, %v920_v26  ;;  %v1966_v28 = vpop.f32.mrb[6].mxu1  ;;  %1991 = vmatprep.mubr.bf16.mxu0 %v984_v23  ;;  %v2939_v23 = vpop.permute.xlu0 %1205 }
 0x292   : > { %v932_v29 = vadd.f32 %v1966_v28, %v1810_v9  ;;  %v923_v30 = vpop.f32.mrb[7].mxu1  ;;  %1992 = vmatmul.mubr.bf16.vlgmr.msra.gmra.mrb[16].mxu0 %v985_v22  ;;  %v973_v32 = vmax.f32 %v929_v25, 0.0 }
 0x293   : > { %v924_v31 = vadd.f32 %v1810_v9, %v923_v30  ;;  %v971_v34 = vmax.f32 %v921_v27, 0.0 }
 0x294   : > { %v974_v33 = vmax.f32 %v932_v29, 0.0 }
 0x295   : > { %v972_v35 = vmax.f32 %v924_v31, 0.0 }
 0x296   : > { %v987_v36 = vpack.c.bf16 %v974_v33, %v973_v32 }
 0x297   : > { %v986_v37 = vpack.c.bf16 %v972_v35, %v971_v34  ;;  %v1969_v38 = vpop.f32.mrb[8].mxu1 }
 0x298   : > { %v945_v39 = vadd.f32 %v1969_v38, %v1810_v9  ;;  %v936_v40 = vpop.f32.mrb[9].mxu1  ;;  %v2956_v38 = vpop.permute.xlu0 %1215 }
 0x299   : > { %v937_v41 = vadd.f32 %v1810_v9, %v936_v40  ;;  %v1970_v42 = vpop.f32.mrb[10].mxu1  ;;  %1995 = vmatprep.mubr.bf16.mxu0 %v986_v37 }
 0x29a   : > { %v948_v43 = vadd.f32 %v1970_v42, %v1810_v9  ;;  %v939_v44 = vpop.f32.mrb[11].mxu1  ;;  %1996 = vmatmul.mubr.bf16.gmra.mrb[20].mxu0 %v987_v36  ;;  %v977_v46 = vmax.f32 %v945_v39, 0.0 }
 0x29b   : > { %v940_v45 = vadd.f32 %v1810_v9, %v939_v44  ;;  %v975_v48 = vmax.f32 %v937_v41, 0.0 }
 0x29c   : > { %v978_v47 = vmax.f32 %v948_v43, 0.0 }
 0x29d   : > { %v976_v49 = vmax.f32 %v940_v45, 0.0 }
 0x29e   : > { %v989_v50 = vpack.c.bf16 %v978_v47, %v977_v46 }
 0x29f   : > { %v988_v51 = vpack.c.bf16 %v976_v49, %v975_v48  ;;  %v1973_v52 = vpop.f32.mrb[12].mxu1 }
 0x2a0   : > { %v961_v53 = vadd.f32 %v1973_v52, %v1810_v9  ;;  %v952_v54 = vpop.f32.mrb[13].mxu1 }
 0x2a1   : > { %v953_v55 = vadd.f32 %v1810_v9, %v952_v54  ;;  %v1974_v56 = vpop.f32.mrb[14].mxu1  ;;  %1999 = vmatprep.mubr.bf16.mxu1 %v988_v51  ;;  %v2966_v51 = vpop.permute.xlu0 %1225 }
 0x2a2   : > { %v964_v57 = vadd.f32 %v1974_v56, %v1810_v9  ;;  %v955_v58 = vpop.f32.mrb[15].mxu1  ;;  %2000 = vmatmul.mubr.bf16.vlgmr.msra.gmra.mrb[16].mxu1 %v989_v50  ;;  %v981_v60 = vmax.f32 %v961_v53, 0.0 }
 0x2a3   : > { %v956_v59 = vadd.f32 %v1810_v9, %v955_v58  ;;  %v979_v62 = vmax.f32 %v953_v55, 0.0  ;;  %v2914_v9 = vpop.permute.xlu1 %1190 }
 0x2a4   : > { %v982_v61 = vmax.f32 %v964_v57, 0.0 }
 0x2a5   : > { %v980_v63 = vmax.f32 %v956_v59, 0.0 }
 0x2a6   : > { %v991_v0 = vpack.c.bf16 %v982_v61, %v981_v60 }
 0x2a7   : > { %v990_v1 = vpack.c.bf16 %v980_v63, %v979_v62  ;;  %v2924_v16 = vpop.permute.xlu1 %1200 }
 0x2a9   : > { %2003 = vmatprep.mubr.bf16.mxu1 %v990_v1 }
 0x2aa   : > { %2004 = vmatmul.mubr.bf16.gmra.mrb[20].mxu1 %v991_v0  ;;  %v2976_v0 = vpop.permute.xlu0 %1235 }
 0x2ab   : > { %v2943_v27 = vpop.permute.xlu1 %1210 }
 0x2af   : > { %v2960_v42 = vpop.permute.xlu1 %1220 }
 0x2b3   : > { %v2971_v57 = vpop.permute.xlu1 %1230 }
 0x365   : > { %v1993_v11 = vpop.f32.mrb[16].mxu0 }
 0x366   : > { %v1094_v13 = vpop.f32.mrb[17].mxu0  ;;  %v2927_v18 = vadd.f32 %v1993_v11, %v2917_v10 }
 0x367   : > { %v2922_v14 = vadd.f32 %v1094_v13, %v2917_v10  ;;  %v1994_v15 = vpop.f32.mrb[18].mxu0 }
 0x368   : > { %v1097_v17 = vpop.f32.mrb[19].mxu0  ;;  %v2935_v21 = vadd.f32 %v1994_v15, %v2917_v10  ;;  %v1255_v24 = vmul.f32 %v2906_v5, %v2927_v18  ;;  %v2980_v15 = vpop.permute.xlu1 %1240 }
 0x369   : > { %v2930_v19 = vadd.f32 %v1097_v17, %v2917_v10  ;;  %v1253_v20 = vmul.f32 %v2902_v3, %v2922_v14 }
 0x36a   : > { %v1256_v29 = vmul.f32 %v2914_v9, %v2935_v21 }
 0x36b   : > { %v1254_v22 = vmul.f32 %v2909_v7, %v2930_v19 }
 0x36d   : > { %v1269_v25 = vadd.f32 %v1254_v22, %v1253_v20  ;;  %v1997_v26 = vpop.f32.mrb[20].mxu0 }
 0x36e   : > { %v1110_v28 = vpop.f32.mrb[21].mxu0  ;;  %v2951_v34 = vadd.f32 %v1997_v26, %v2917_v10 }
 0x36f   : > { %v1270_v30 = vadd.f32 %v1269_v25, %v1255_v24  ;;  %v2948_v31 = vadd.f32 %v1110_v28, %v2917_v10  ;;  %v1998_v32 = vpop.f32.mrb[22].mxu0 }
 0x370   : > { %v1113_v33 = vpop.f32.mrb[23].mxu0  ;;  %v1122_v40 = vadd.f32 %v1998_v32, %v2917_v10  ;;  %v1259_v43 = vmul.f32 %v2939_v23, %v2951_v34 }
 0x371   : > { %v1257_v35 = vmul.f32 %v2919_v12, %v2948_v31  ;;  %v1271_v36 = vadd.f32 %v1270_v30, %v1256_v29  ;;  %v1114_v37 = vadd.f32 %v1113_v33, %v2917_v10  ;;  %v2987_v30 = vpop.permute.xlu0 %1245 }
 0x372   : > { %v1260_v47 = vmul.f32 %v2943_v27, %v1122_v40 }
 0x373   : > { %v1272_v39 = vadd.f32 %v1271_v36, %v1257_v35  ;;  %v1258_v41 = vmul.f32 %v2924_v16, %v1114_v37  ;;  %v2990_v35 = vpop.permute.xlu1 %1250 }
 0x375   : > { %v1273_v44 = vadd.f32 %v1272_v39, %v1258_v41  ;;  %v2001_v45 = vpop.f32.mrb[16].mxu1 }
 0x376   : > { %v1126_v46 = vpop.f32.mrb[17].mxu1  ;;  %v1135_v53 = vadd.f32 %v2001_v45, %v2917_v10 }
 0x377   : > { %v1274_v48 = vadd.f32 %v1273_v44, %v1259_v43  ;;  %v1127_v49 = vadd.f32 %v1126_v46, %v2917_v10  ;;  %v2002_v50 = vpop.f32.mrb[18].mxu1 }
 0x378   : > { %v1129_v52 = vpop.f32.mrb[19].mxu1  ;;  %v1138_v59 = vadd.f32 %v2002_v50, %v2917_v10  ;;  %v1263_v61 = vmul.f32 %v2966_v51, %v1135_v53 }
 0x379   : > { %v1261_v54 = vmul.f32 %v2956_v38, %v1127_v49  ;;  %v1275_v55 = vadd.f32 %v1274_v48, %v1260_v47  ;;  %v1130_v56 = vadd.f32 %v1129_v52, %v2917_v10 }
 0x37a   : > { %v1264_v2 = vmul.f32 %v2971_v57, %v1138_v59 }
 0x37b   : > { %v1276_v58 = vadd.f32 %v1275_v55, %v1261_v54  ;;  %v1262_v60 = vmul.f32 %v2960_v42, %v1130_v56 }
 0x37d   : > { %v1277_v62 = vadd.f32 %v1276_v58, %v1262_v60  ;;  %v2005_v63 = vpop.f32.mrb[20].mxu1 }
 0x37e   : > { %v1142_v1 = vpop.f32.mrb[21].mxu1  ;;  %v1151_v20 = vadd.f32 %v2005_v63, %v2917_v10 }
 0x37f   : > { %v1278_v6 = vadd.f32 %v1277_v62, %v1263_v61  ;;  %v1143_v11 = vadd.f32 %v1142_v1, %v2917_v10  ;;  %v2006_v13 = vpop.f32.mrb[22].mxu1 }
 0x380   : > { %v1145_v17 = vpop.f32.mrb[23].mxu1  ;;  %v1154_v28 = vadd.f32 %v2006_v13, %v2917_v10  ;;  %v1267_v32 = vmul.f32 %v2987_v30, %v1151_v20 }
 0x381   : > { %v1265_v22 = vmul.f32 %v2976_v0, %v1143_v11  ;;  %v1279_v24 = vadd.f32 %v1278_v6, %v1264_v2  ;;  %v1146_v25 = vadd.f32 %v1145_v17, %v2917_v10 }
 0x382   : > { %v1268_v36 = vmul.f32 %v2990_v35, %v1154_v28 }
 0x383   : > { %v1280_v26 = vadd.f32 %v1279_v24, %v1265_v22  ;;  %v1266_v29 = vmul.f32 %v2980_v15, %v1146_v25 }
 0x385   : > { %v1281_v33 = vadd.f32 %v1280_v26, %v1266_v29 }
 0x387   : > { %v1282_v39 = vadd.f32 %v1281_v33, %v1267_v32 }
 0x389   : > { %v1283_v41 = vadd.f32 %v1282_v39, %v1268_v36 }
 0x38b   : > { %v1284_v43 = vrot.slane %v1283_v41, 4 }
 0x38d   : > { %v1285_v44 = vadd.f32 %v1284_v43, %v1283_v41 }
 0x38f   : > { %v1286_v45 = vrot.slane %v1285_v44, 2 }
 0x391   : > { %v1287_v46 = vadd.f32 %v1286_v45, %v1285_v44 }
 0x393   : > { %v1288_v47 = vrot.slane %v1287_v46, 1 }
 0x395   : > { %v1289_v48 = vadd.f32 %v1288_v47, %v1287_v46 }
 0x397   : > { %v1290_v10 = vmul.f32 0.083333336, %v1289_v48 }
 0x399   : > { %v2994_v50 = vsub.f32 %v2922_v14, %v1290_v10  ;;  %v2997_v52 = vsub.f32 %v2930_v19, %v1290_v10  ;;  %v3000_v54 = vsub.f32 %v2927_v18, %v1290_v10  ;;  %v3003_v55 = vsub.f32 %v2935_v21, %v1290_v10 }
 0x39a   : > { %v3006_v58 = vsub.f32 %v2948_v31, %v1290_v10  ;;  %v3008_v60 = vsub.f32 %v1114_v37, %v1290_v10  ;;  %v3011_v61 = vsub.f32 %v2951_v34, %v1290_v10  ;;  %v3013_v62 = vsub.f32 %v1122_v40, %v1290_v10 }
 0x39b   : > { %v3015_v14 = vsub.f32 %v1127_v49, %v1290_v10  ;;  %v3017_v19 = vsub.f32 %v1130_v56, %v1290_v10  ;;  %v3019_v63 = vsub.f32 %v1135_v53, %v1290_v10  ;;  %v3021_v18 = vsub.f32 %v1138_v59, %v1290_v10 }
 0x39c   : > { %v3023_v21 = vsub.f32 %v1143_v11, %v1290_v10  ;;  %v3025_v1 = vsub.f32 %v1146_v25, %v1290_v10  ;;  %v3027_v31 = vsub.f32 %v1151_v20, %v1290_v10  ;;  %v3029_v37 = vsub.f32 %v1154_v28, %v1290_v10 }
 0x39d   : > { %v1307_v34 = vmul.f32 %v2994_v50, %v2902_v3  ;;  %v1308_v40 = vmul.f32 %v2997_v52, %v2909_v7  ;;  %v1309_v49 = vmul.f32 %v3000_v54, %v2906_v5  ;;  %v1310_v59 = vmul.f32 %v3003_v55, %v2914_v9 }
 0x39e   : > { %v1311_v2 = vmul.f32 %v3006_v58, %v2919_v12  ;;  %v1312_v13 = vmul.f32 %v3008_v60, %v2924_v16  ;;  %v1313_v22 = vmul.f32 %v3011_v61, %v2939_v23  ;;  %v1314_v26 = vmul.f32 %v3013_v62, %v2943_v27 }
 0x39f   : > { %v1323_v53 = vmul.f32 %v1307_v34, %v1307_v34  ;;  %v1324_v56 = vmul.f32 %v1308_v40, %v1308_v40  ;;  %v1325_v6 = vmul.f32 %v1309_v49, %v1309_v49  ;;  %v1326_v17 = vmul.f32 %v1310_v59, %v1310_v59 }
 0x3a0   : > { %v1327_v24 = vmul.f32 %v1311_v2, %v1311_v2  ;;  %v1328_v28 = vmul.f32 %v1312_v13, %v1312_v13  ;;  %v1315_v32 = vmul.f32 %v3015_v14, %v2956_v38  ;;  %v1329_v33 = vmul.f32 %v1313_v22, %v1313_v22 }
 0x3a1   : > { %v1339_v11 = vadd.f32 %v1324_v56, %v1323_v53  ;;  %v1316_v39 = vmul.f32 %v3017_v19, %v2960_v42  ;;  %v1330_v41 = vmul.f32 %v1314_v26, %v1314_v26  ;;  %v1317_v44 = vmul.f32 %v3019_v63, %v2966_v51 }
 0x3a2   : > { %v1331_v45 = vmul.f32 %v1315_v32, %v1315_v32  ;;  %v1318_v47 = vmul.f32 %v3021_v18, %v2971_v57  ;;  %v1319_v34 = vmul.f32 %v3023_v21, %v2976_v0  ;;  %v1320_v53 = vmul.f32 %v3025_v1, %v2980_v15 }
 0x3a3   : > { %v1340_v20 = vadd.f32 %v1339_v11, %v1325_v6  ;;  %v1332_v48 = vmul.f32 %v1316_v39, %v1316_v39  ;;  %v1333_v40 = vmul.f32 %v1317_v44, %v1317_v44  ;;  %v1321_v2 = vmul.f32 %v3027_v31, %v2987_v30 }
 0x3a4   : > { %v1334_v56 = vmul.f32 %v1318_v47, %v1318_v47  ;;  %v1335_v6 = vmul.f32 %v1319_v34, %v1319_v34  ;;  %v1322_v13 = vmul.f32 %v3029_v37, %v2990_v35 }
 0x3a5   : > { %v1341_v25 = vadd.f32 %v1340_v20, %v1326_v17  ;;  %v1336_v17 = vmul.f32 %v1320_v53, %v1320_v53  ;;  %v1337_v22 = vmul.f32 %v1321_v2, %v1321_v2 }
 0x3a7   : > { %v1342_v29 = vadd.f32 %v1341_v25, %v1327_v24  ;;  %v1338_v25 = vmul.f32 %v1322_v13, %v1322_v13 }
 0x3a9   : > { %v1343_v36 = vadd.f32 %v1342_v29, %v1328_v28 }
 0x3ab   : > { %v1344_v43 = vadd.f32 %v1343_v36, %v1329_v33 }
 0x3ad   : > { %v1345_v46 = vadd.f32 %v1344_v43, %v1330_v41 }
 0x3af   : > { %v1346_v10 = vadd.f32 %v1345_v46, %v1331_v45  ;;  %v1381_v45 = vsub.s32 1, %v2904_v4  ;;  %v1401_v46 = vsub.s32 2, %v2904_v4 }
 0x3b1   : > { %v1347_v49 = vadd.f32 %v1346_v10, %v1332_v48  ;;  %v1382_v48 = vrot.slane %v2912_v8, %v1381_v45  ;;  %v1402_v10 = vrot.slane %v2912_v8, %v1401_v46 }
 0x3b3   : > { %v1348_v59 = vadd.f32 %v1347_v49, %v1333_v40 }
 0x3b5   : > { %v1349_v11 = vadd.f32 %v1348_v59, %v1334_v56 }
 0x3b7   : > { %v1350_v20 = vadd.f32 %v1349_v11, %v1335_v6 }
 0x3b9   : > { %v1351_v24 = vadd.f32 %v1350_v20, %v1336_v17 }
 0x3bb   : > { %v1352_v26 = vadd.f32 %v1351_v24, %v1337_v22 }
 0x3bd   : > { %v1353_v28 = vadd.f32 %v1352_v26, %v1338_v25 }
 0x3bf   : > { %v1354_v29 = vrot.slane %v1353_v28, 4 }
 0x3c1   : > { %v1355_v32 = vadd.f32 %v1354_v29, %v1353_v28 }
 0x3c3   : > { %v1356_v33 = vrot.slane %v1355_v32, 2 }
 0x3c5   : > { %v1357_v36 = vadd.f32 %v1356_v33, %v1355_v32 }
 0x3c7   : > { %v1358_v39 = vrot.slane %v1357_v36, 1 }
 0x3c9   : > { %v1359_v41 = vadd.f32 %v1358_v39, %v1357_v36 }
 0x3cb   : > { %v1360_v43 = vmul.f32 0.083333336, %v1359_v41 }
 0x3cd   : > { %v1361_v44 = vadd.f32 1e-05, %v1360_v43 }
 0x3cf   : > { %2174 = vrsqrt.f32 %v1361_v44 }
 0x3d9   : > { %v2175_v47 = vpop.eup %2174 }
 0x3da   : > { %v1363_v34 = vmul.f32 %v2175_v47, %v2994_v50  ;;  %v1364_v40 = vmul.f32 %v2175_v47, %v2997_v52  ;;  %v1365_v49 = vmul.f32 %v2175_v47, %v3000_v54  ;;  %v1366_v53 = vmul.f32 %v2175_v47, %v3003_v55 }
 0x3db   : > { %v1367_v56 = vmul.f32 %v2175_v47, %v3006_v58  ;;  %v1368_v59 = vmul.f32 %v2175_v47, %v3008_v60  ;;  %v1369_v2 = vmul.f32 %v2175_v47, %v3011_v61  ;;  %v1370_v4 = vmul.f32 %v2175_v47, %v3013_v62 }
 0x3dc   : > { %v1371_v6 = vmul.f32 %v2175_v47, %v3015_v14  ;;  %v1372_v8 = vmul.f32 %v2175_v47, %v3017_v19  ;;  %v1373_v50 = vmul.f32 %v2175_v47, %v3019_v63  ;;  %v1374_v52 = vmul.f32 %v2175_v47, %v3021_v18 }
 0x3dd   : > { %v1375_v54 = vmul.f32 %v2175_v47, %v3023_v21  ;;  %v1376_v55 = vmul.f32 %v2175_v47, %v3025_v1  ;;  %v1377_v58 = vmul.f32 %v2175_v47, %v3027_v31  ;;  %v1378_v60 = vmul.f32 %v2175_v47, %v3029_v37 }
 0x3de   : > { %v1383_v11 = vmul.f32 %v1382_v48, %v1363_v34  ;;  %v1384_v61 = vmul.f32 %v1382_v48, %v1364_v40  ;;  %v1385_v13 = vmul.f32 %v1382_v48, %v1365_v49  ;;  %v1386_v62 = vmul.f32 %v1382_v48, %v1366_v53 }
 0x3df   : > { %v1387_v17 = vmul.f32 %v1382_v48, %v1367_v56  ;;  %v1388_v14 = vmul.f32 %v1382_v48, %v1368_v59  ;;  %v1389_v20 = vmul.f32 %v1382_v48, %v1369_v2  ;;  %v1390_v19 = vmul.f32 %v1382_v48, %v1370_v4 }
 0x3e0   : > { %v1391_v22 = vmul.f32 %v1382_v48, %v1371_v6  ;;  %v1392_v63 = vmul.f32 %v1382_v48, %v1372_v8  ;;  %v1393_v24 = vmul.f32 %v1382_v48, %v1373_v50  ;;  %v1394_v18 = vmul.f32 %v1382_v48, %v1374_v52 }
 0x3e1   : > { %v1395_v25 = vmul.f32 %v1382_v48, %v1375_v54  ;;  %v1396_v21 = vmul.f32 %v1382_v48, %v1376_v55  ;;  %v1397_v26 = vmul.f32 %v1382_v48, %v1377_v58  ;;  %v1398_v1 = vmul.f32 %v1382_v48, %v1378_v60 }
 0x3e2   : > { %v1403_v28 = vadd.f32 %v1402_v10, %v1383_v11  ;;  %v1404_v31 = vadd.f32 %v1402_v10, %v1384_v61  ;;  %v1405_v29 = vadd.f32 %v1402_v10, %v1385_v13  ;;  %v1406_v37 = vadd.f32 %v1402_v10, %v1386_v62 }
 0x3e3   : > { %v1407_v32 = vadd.f32 %v1402_v10, %v1387_v17  ;;  %v1408_v33 = vadd.f32 %v1402_v10, %v1388_v14  ;;  %v1409_v36 = vadd.f32 %v1402_v10, %v1389_v20  ;;  %v1410_v39 = vadd.f32 %v1402_v10, %v1390_v19  ;;  %1438 = sbr.rel (%p1827_p4) target bundleno = 1012 (0x3f4), region = 96 }
 0x3e4   : > { %v1411_v41 = vadd.f32 %v1402_v10, %v1391_v22  ;;  %v1412_v43 = vadd.f32 %v1402_v10, %v1392_v63  ;;  %v1413_v44 = vadd.f32 %v1402_v10, %v1393_v24  ;;  %v1414_v45 = vadd.f32 %v1402_v10, %v1394_v18 }
 0x3e5   : > { %v1415_v46 = vadd.f32 %v1402_v10, %v1395_v25  ;;  %v1416_v47 = vadd.f32 %v1402_v10, %v1396_v21  ;;  %v1417_v34 = vadd.f32 %v1402_v10, %v1397_v26  ;;  %v1418_v40 = vadd.f32 %v1402_v10, %v1398_v1 }
 0x3e6   : > { %v1419_v49 = vmul.f32 %v1403_v28, %v2902_v3  ;;  %v1420_v48 = vmul.f32 %v1404_v31, %v2909_v7  ;;  %v3086_v53 = vmul.f32 %v1405_v29, %v2906_v5  ;;  %v3089_v56 = vmul.f32 %v1406_v37, %v2914_v9 }
 0x3e7   : > { %v3092_v59 = vmul.f32 %v1407_v32, %v2919_v12  ;;  %v3095_v2 = vmul.f32 %v1408_v33, %v2924_v16  ;;  %v3098_v4 = vmul.f32 %v1409_v36, %v2939_v23  ;;  %v3101_v10 = vmul.f32 %v1410_v39, %v2943_v27 }
 0x3e8   : > { %v3104_v3 = vmul.f32 %v1411_v41, %v2956_v38  ;;  %v3107_v5 = vmul.f32 %v1412_v43, %v2960_v42  ;;  %v3110_v7 = vmul.f32 %v1413_v44, %v2966_v51  ;;  %v3113_v9 = vmul.f32 %v1414_v45, %v2971_v57 }
 0x3e9   : > { %v3116_v12 = vmul.f32 %v1415_v46, %v2976_v0  ;;  %v3119_v16 = vmul.f32 %v1416_v47, %v2980_v15  ;;  %v3122_v23 = vmul.f32 %v1417_v34, %v2987_v30  ;;  %v3125_v27 = vmul.f32 %v1418_v40, %v2990_v35 }
 0x3ea   : > { %v1439_v38 = vmax.f32 %v1419_v49, 0.0  ;;  %v1440_v42 = vmax.f32 %v1420_v48, 0.0  ;;  %v1441_v51 = vmax.f32 %v3086_v53, 0.0  ;;  %v1442_v57 = vmax.f32 %v3089_v56, 0.0 }
 0x3eb   : > { %v1443_v0 = vmax.f32 %v3092_v59, 0.0  ;;  %v1444_v15 = vmax.f32 %v3095_v2, 0.0  ;;  %v1445_v30 = vmax.f32 %v3098_v4, 0.0  ;;  %v1446_v35 = vmax.f32 %v3101_v10, 0.0 }
 0x3ec   : > { %1455 = vst [vmem:[#allocation2] sm:$0xff] %v1439_v38  ;;  %1456 = vst [vmem:[#allocation2 + $0x8] sm:$0xff] %v1440_v42  ;;  %v1447_v6 = vmax.f32 %v3104_v3, 0.0  ;;  %v1448_v8 = vmax.f32 %v3107_v5, 0.0  ;;  %v1449_v50 = vmax.f32 %v3110_v7, 0.0  ;;  %v1450_v52 = vmax.f32 %v3113_v9, 0.0 }
 0x3ed   : > { %1457 = vst [vmem:[#allocation2 + $0x10] sm:$0xff] %v1441_v51  ;;  %1458 = vst [vmem:[#allocation2 + $0x18] sm:$0xff] %v1442_v57  ;;  %v1451_v54 = vmax.f32 %v3116_v12, 0.0  ;;  %v1452_v55 = vmax.f32 %v3119_v16, 0.0  ;;  %v1453_v58 = vmax.f32 %v3122_v23, 0.0  ;;  %v1454_v60 = vmax.f32 %v3125_v27, 0.0 }
 0x3ee   : > { %1459 = vst [vmem:[#allocation2 + $0x20] sm:$0xff] %v1443_v0  ;;  %1460 = vst [vmem:[#allocation2 + $0x28] sm:$0xff] %v1444_v15 }
 0x3ef   : > { %1461 = vst [vmem:[#allocation2 + $0x30] sm:$0xff] %v1445_v30  ;;  %1462 = vst [vmem:[#allocation2 + $0x38] sm:$0xff] %v1446_v35 }
 0x3f0   : > { %1463 = vst [vmem:[#allocation2 + $0x40] sm:$0xff] %v1447_v6  ;;  %1464 = vst [vmem:[#allocation2 + $0x48] sm:$0xff] %v1448_v8 }
 0x3f1   : > { %1465 = vst [vmem:[#allocation2 + $0x50] sm:$0xff] %v1449_v50  ;;  %1466 = vst [vmem:[#allocation2 + $0x58] sm:$0xff] %v1450_v52 }
 0x3f2   : > { %1467 = vst [vmem:[#allocation2 + $0x60] sm:$0xff] %v1451_v54  ;;  %1468 = vst [vmem:[#allocation2 + $0x68] sm:$0xff] %v1452_v55 }
 0x3f3   : > { %1469 = vst [vmem:[#allocation2 + $0x70] sm:$0xff] %v1453_v58  ;;  %1470 = vst [vmem:[#allocation2 + $0x78] sm:$0xff] %v1454_v60 }
 0x3f4 PF: > { %p1828_p0 = scmp.ne.s32.totalorder %s2503_s25, 2 }
 0x3f5   : > { %v1475_v11 = vpack.c.bf16 (!%p1828_p0), %v1420_v48, %v1419_v49  ;;  %v2415_v61 = vmov (!%p1828_p0), 0.0   ;;  %v2177_v13 = vld [vmem:[#allocation6] sm:$0xff] (!%p1828_p0)   ;;  %v1476_v62 = vpack.c.bf16 (!%p1828_p0), %v3089_v56, %v3086_v53  ;;  %s3264_s30 = sld [smem:[#allocation20_spill]] (!%p1828_p0)  ;;  %vm2416_vm0 = vmmov (!%p1828_p0), 0   ;;  %v2178_v20 = vld [vmem:[#allocation6 + $0x8] sm:$0xff] (!%p1828_p0)   ;;  %v2179_v22 = vld [vmem:[#allocation6 + $0x10] sm:$0xff] (!%p1828_p0)  }
 0x3f6   : > { %1473 = sbr.rel (%p1828_p0) target bundleno = 1477 (0x5c5), region = 100  ;;  %2007 = vmatprep.subr.bf16.mxu0 (!%p1828_p0), %v2415_v61  ;;  %2027 = vmatprep.subr.bf16.mxu1 (!%p1828_p0), %v2415_v61  ;;  %v2417_v14 = vmov (!%p1828_p0), 0   ;;  %v1477_v19 = vpack.c.bf16 (!%p1828_p0), %v3095_v2, %v3092_v59  ;;  %v1478_v63 = vpack.c.bf16 (!%p1828_p0), %v3101_v10, %v3098_v4  ;;  %v2180_v24 = vld [vmem:[#allocation6 + $0x18] sm:$0xff] (!%p1828_p0)   ;;  %v1479_v18 = vpack.c.bf16 (!%p1828_p0), %v3107_v5, %v3104_v3  ;;  %v2181_v25 = vld [vmem:[#allocation6 + $0x20] sm:$0xff] (!%p1828_p0)   ;;  %v2182_v26 = vld [vmem:[#allocation6 + $0x28] sm:$0xff] (!%p1828_p0)   ;;  %s3265_s14 = sld [smem:[#allocation19_spill]] (!%p1828_p0) }
 0x3f7   : > { %2008 = vmatpush3.bf16.msra.mxu0 (!%p1828_p0), %v1475_v11  ;;  %2023 = vmatprep.mubr.msk.bf16.mxu0 (!%p1828_p0), %vm2416_vm0, %v2415_v61  ;;  %v1480_v21 = vpack.c.bf16 (!%p1828_p0), %v3113_v9, %v3110_v7  ;;  %v1481_v1 = vpack.c.bf16 (!%p1828_p0), %v3119_v16, %v3116_v12  ;;  %v2183_v28 = vld [vmem:[#allocation6 + $0x30] sm:$0xff] (!%p1828_p0)   ;;  %v1482_v31 = vpack.c.bf16 (!%p1828_p0), %v3125_v27, %v3122_v23  ;;  %v2184_v37 = vld [vmem:[#allocation6 + $0x38] sm:$0xff] (!%p1828_p0)   ;;  %s3266_s17 = sld [smem:[#allocation21_spill]] (!%p1828_p0) }
 0x3f8   : > { %2009 = vmatprep.subr.bf16.mxu0 (!%p1828_p0), %v2415_v61  ;;  %2176 = vset.pattern.permute.xlu0 (!%p1828_p0), %v2417_v14 }
 0x3f9   : > { %2028 = vmatpush3.bf16.msra.mxu1 (!%p1828_p0), %v2177_v13  ;;  %2043 = vmatprep.mubr.msk.bf16.mxu1 (!%p1828_p0), %vm2416_vm0, %v2415_v61 }
 0x3fa   : > { %2029 = vmatprep.subr.bf16.mxu1 (!%p1828_p0), %v2415_v61 }
 0x3fb   : > { %v1523_v17 = vld [vmem:[%s3264_s30] sm:$0xff] (!%p1828_p0)  ;;  %2010 = vmatpush3.bf16.msra.mxu0 (!%p1828_p0), %v1476_v62 }
 0x3fc   : > { %1526 = vperm.xlu0 (!%p1828_p0), %2176, %v1523_v17   ;;  %2011 = vmatprep.subr.bf16.mxu0 (!%p1828_p0), %v2415_v61  ;;  %v1474_v29 = vld [vmem:[%s3265_s14] sm:$0xf] (!%p1828_p0) }
 0x3fd   : > { %2030 = vmatpush3.bf16.msra.mxu1 %v2178_v20  ;;  %v1829_v45 = vld [vmem:[%s3266_s17] ss:$0 sm:$0xff] }
 0x3fe   : > { %2031 = vmatprep.subr.bf16.mxu1 %v2415_v61 }
 0x3ff   : > { %2012 = vmatpush3.bf16.msra.mxu0 %v1477_v19 }
 0x400   : > { %2013 = vmatprep.subr.bf16.mxu0 %v2415_v61 }
 0x401   : > { %2032 = vmatpush3.bf16.msra.mxu1 %v2179_v22 }
 0x402   : > { %2033 = vmatprep.subr.bf16.mxu1 %v2415_v61 }
 0x403   : > { %2014 = vmatpush3.bf16.msra.mxu0 %v1478_v63 }
 0x404   : > { %2015 = vmatprep.subr.bf16.mxu0 %v2415_v61 }
 0x405   : > { %2034 = vmatpush3.bf16.msra.mxu1 %v2180_v24 }
 0x406   : > { %2035 = vmatprep.subr.bf16.mxu1 %v2415_v61 }
 0x407   : > { %2016 = vmatpush3.bf16.msra.mxu0 %v1479_v18 }
 0x408   : > { %2017 = vmatprep.subr.bf16.mxu0 %v2415_v61 }
 0x409   : > { %2036 = vmatpush3.bf16.msra.mxu1 %v2181_v25 }
 0x40a   : > { %2037 = vmatprep.subr.bf16.mxu1 %v2415_v61 }
 0x40b   : > { %2018 = vmatpush3.bf16.msra.mxu0 %v1480_v21 }
 0x40c   : > { %2019 = vmatprep.subr.bf16.mxu0 %v2415_v61 }
 0x40d   : > { %2038 = vmatpush3.bf16.msra.mxu1 %v2182_v26 }
 0x40e   : > { %2039 = vmatprep.subr.bf16.mxu1 %v2415_v61 }
 0x40f   : > { %2020 = vmatpush3.bf16.msra.mxu0 %v1481_v1 }
 0x410   : > { %2021 = vmatprep.subr.bf16.mxu0 %v2415_v61 }
 0x411   : > { %2040 = vmatpush3.bf16.msra.mxu1 %v2183_v28 }
 0x412   : > { %2041 = vmatprep.subr.bf16.mxu1 %v2415_v61 }
 0x413   : > { %2022 = vmatpush3.bf16.msra.mxu0 %v1482_v31 }
 0x415   : > { %2042 = vmatpush3.bf16.msra.mxu1 %v2184_v37 }
 0x416   : > { %2024 = vmatmul.mubr.bf16.vlgmr.msra.gmra.mrb[0].mxu0 %v1474_v29 }
 0x47b   : > { %v1527_v32 = vpop.permute.xlu0 %1526 }
 0x4e9   : > { %v1517_v33 = vpop.f32.mrb[0].mxu0 }
 0x4ea   : > { %v1529_v36 = vmul.f32 %v1527_v32, %v1517_v33  ;;  %v2025_v39 = vpop.f32.mrb[1].mxu0 }
 0x4eb   : > { %v1520_v41 = vpop.f32.mrb[2].mxu0 }
 0x4ec   : > { %v1530_v43 = vpack.c.bf16 %v1529_v36, %v1529_v36  ;;  %v2026_v44 = vpop.f32.mrb[3].mxu0 }
 0x4ee   : > { %2044 = vmatmul.mubr.bf16.vlgmr.msra.gmra.mrb[0].mxu1 %v1530_v43 }
 0x5c1   : > { %v1636_v46 = vpop.f32.mrb[0].mxu1 }
 0x5c2   : > { %v1637_v47 = vadd.f32 %v1829_v45, %v1636_v46  ;;  %v2045_v34 = vpop.f32.mrb[1].mxu1 }
 0x5c3   : > { %v1639_v40 = vpop.f32.mrb[2].mxu1 }
 0x5c4   : > { %1642 = vst [vmem:[#allocation11] sm:$0xff] %v1637_v47  ;;  %v2046_v49 = vpop.f32.mrb[3].mxu1 }
 0x5c5 PF: > { %s2418_s27 = smov [#allocation11]  }
 0x5c6   : > { %s1650_s6 = sshll.u32 %s2418_s27, 4  ;;  %s1651_s6 = int_to_ptr.vmem [resolvable:$true] %s1650_s6 }
 0x5c7   : > { %s2331_s24 = scalar_lea.vmem %s1651_s6, 128  ;;  %p2338_p13 = scmp.lt.s32.totalorder %s1651_s6, %s1651_s6 }
 0x5c8   : > { %p2332_p8 = scmp.ne.s32.totalorder %s1651_s6, %s2331_s24  ;;  %p2339_p9 = scmp.lt.s32.totalorder %s2331_s24, %s2331_s24 }
 0x5ca   : > { %p2333_p11 = pnand %p2332_p8, %p1827_p4  ;;  %p2340_p5 = por %p2339_p9, %p2338_p13 }
 0x5cc   : > { %p2334_p7 = pneg %p2333_p11 }
 0x5ce   : > { %p2341_p10 = pnand %p2340_p5, %p2334_p7 }
 0x5d0   : > { %2344 = shalt.err (!%p2341_p10)
}
 0x5d1   : > { %s3267_s18 = sld [smem:[#allocation22_spill]] }
 0x5d7   : > { %s2345_s26 = scalar_lea.hbm %s3267_s18, 128 }
 0x5d8   : > { %p2346_p1 = scmp.ne.s32.totalorder %s3267_s18, %s2345_s26  ;;  %p2351_p2 = scmp.lt.u32.totalorder %s2345_s26, %s3267_s18 }
 0x5da   : > { %p2347_p3 = pnand %p2346_p1, %p1827_p4 }
 0x5dc   : > { %p2348_p12 = pneg %p2347_p3 }
 0x5de   : > { %p2353_p6 = pnand %p2351_p2, %p2348_p12 }
 0x5e0   : > { %2356 = shalt.err (!%p2353_p6)
}
 0x5e1   : > { %2078 = dma.vmem_to_hbm [thread:$0]  (%p1827_p4), %s1651_s6, 128, %s3267_s18, [#allocation5]  }
 0x5e2   : > { %2386 = dma.done.wait (%p1827_p4), [#allocation5], 128  }
 0x5e3   : > { %2388 = vsyncadd (%p1827_p4), [#allocation5], 4294967168 }
 0x5e4 PF: > { %s3268_s24 = sld [smem:[#allocation16_spill]]  ;;  %s3269_s2 = sld [smem:[#allocation17_spill]] }
 0x5e5   : > { %s3270_s21 = smov %s2395_s22  ;;  %s3271_s22 = smov %s2399_s23 }
 0x5ea   : > { %p22_p0 = scmp.ge.s32.totalorder %s3268_s24, 5   ;;  %s3272_s23 = smov %s3269_s2 }
 0x5ec   :  { %24 = sbr.rel (!%p22_p0) target bundleno = 10 (0xa), region = 152 }
 0x5f3   :  { %1663 = vsyncpa [#allocation4], 1 }
 0x5f4   :  { %1665 = vsyncpa [#allocation4 + $0x1], 1 }
 0x5f5   :  { %1666 = vsyncpa [#allocation7], 1 }
 0x5f6   :  { %1667 = vsyncpa [#allocation5], 1 }
 0x5f7   :  { %1669 = vsyncpa [#allocation5 + $0x1], 1 }

</bundles_post_ra>
